<compile_context>
chip_gen: v7x
topology: tpu7x:2x2x1
jax: 0.10.0
libtpu: 0.0.40
codegen_flags: <defaults>
</compile_context>

<pallas_src>
import jax
import jax.numpy as jnp
from jax import lax
from jax.experimental import pallas as pl
from jax.experimental.pallas import tpu as pltpu


def _upsample_conv_bn_relu_kernel(x_ref, wk_ref, shift_ref, o_ref, patch_ref):
    """One image per grid step.

    x_ref:     (1, H+2, W+2, Cin)   zero-padded LOW-RES image (NHWC)
    wk_ref:    (2, 6*Cin, 2*Cout)   folded parity weights (row parity a = 0/1)
    shift_ref: (1, 2*Cout)          folded conv-bias + BN shift (tiled over col parity)
    o_ref:     (1, H*W, 4*Cout)     packed output: cols = [a=0 | a=1] x [b=0 | b=1] x Cout
    patch_ref: (H, W, 9*Cin)        VMEM scratch for the shared im2col patch matrix
    """
    h = x_ref.shape[1] - 2
    w = x_ref.shape[2] - 2
    cin = x_ref.shape[3]
    n2co = wk_ref.shape[2]                       # 2*Cout

    # Shared im2col over the 3x3 low-res window -- built once per image,
    # reused by both row parities (column slices below) and both column
    # parities (folded into the weight columns).  Slice x_ref per tap so the
    # full padded image is never kept live across the unrolled copies.
    for ip in range(3):
        for jp in range(3):
            k = 3 * ip + jp
            patch_ref[:, :, k * cin:(k + 1) * cin] = x_ref[0, ip:ip + h, jp:jp + w, :]

    patches = patch_ref[...].reshape(h * w, 9 * cin)

    # Dead-tap elimination:
    #   row parity a=0 only reads window rows ip in {0,1} -> cols [0, 6*Cin)
    #   row parity a=1 only reads window rows ip in {1,2} -> cols [3*Cin, 9*Cin)
    acc0 = jnp.dot(patches[:, :6 * cin], wk_ref[0],
                   preferred_element_type=jnp.float32)       # (H*W, 2*Cout)
    acc1 = jnp.dot(patches[:, 3 * cin:], wk_ref[1],
                   preferred_element_type=jnp.float32)       # (H*W, 2*Cout)

    # Folded conv-bias + BN shift, then ReLU (epilogue kept in f32).
    shift = shift_ref[...]                                   # (1, 2*Cout)
    o_ref[0, :, :n2co] = jnp.maximum(acc0 + shift, 0.0).astype(o_ref.dtype)
    o_ref[0, :, n2co:] = jnp.maximum(acc1 + shift, 0.0).astype(o_ref.dtype)


def _fold_parity_weights(conv_w_oihw, conv_b, bn_gamma, bn_beta, bn_mean,
                         bn_var, eps):
    """Fold BN(eval) into the conv and build the compact parity-class weights."""
    cout, cin, _, _ = conv_w_oihw.shape
    inv_std = 1.0 / jnp.sqrt(bn_var.astype(jnp.float32) + eps)
    scale = bn_gamma.astype(jnp.float32) * inv_std                      # (Cout,)
    shift = (conv_b.astype(jnp.float32) - bn_mean.astype(jnp.float32)) * scale \
        + bn_beta.astype(jnp.float32)                                   # (Cout,)

    # HWIO, with the BN scale folded into the output-channel axis (exact).
    w_hwio = jnp.transpose(conv_w_oihw, (2, 3, 1, 0)).astype(jnp.float32) * scale

    # Output pixel (2p+a, 2q+b) of upsample->conv equals a small-tap conv on
    # the padded low-res image; tap (dy, dx) of the original 3x3 kernel lands
    # at low-res window offset (ip, jp) below (window anchored at padded (p,q)).
    wk_full = jnp.zeros((2, 9 * cin, 2 * cout), jnp.float32)
    for a in range(2):
        for b in range(2):
            for dy in range(3):
                for dx in range(3):
                    ip = 1 + (a + dy - 1) // 2
                    jp = 1 + (b + dx - 1) // 2
                    r0 = (3 * ip + jp) * cin
                    c0 = b * cout
                    wk_full = wk_full.at[a, r0:r0 + cin, c0:c0 + cout].add(
                        w_hwio[dy, dx])

    # a=0 never touches window row ip=2 (rows [6*Cin, 9*Cin) are zero);
    # a=1 never touches ip=0 (rows [0, 3*Cin) are zero).  Keep only the 6*Cin
    # live rows, matching the contiguous patch slices taken inside the kernel.
    wk6 = jnp.stack([wk_full[0, :6 * cin], wk_full[1, 3 * cin:]])   # (2, 6Cin, 2Cout)
    shift2 = jnp.tile(shift, 2).reshape(1, 2 * cout)                # [b=0 | b=1]
    return wk6, shift2


def upsampling_layer_forward(x_nchw, conv_w_oihw, conv_b,
                             bn_gamma, bn_beta, bn_mean, bn_var, eps=1e-5):
    """Replicates UpsamplingLayer.forward (eval-mode BN) for NCHW input x."""
    n, cin, h, w = x_nchw.shape
    cout = conv_w_oihw.shape[0]

    # Low-res NHWC, zero-padded by 1.  This single pad on the LOW-RES image
    # implements the conv's padding=1 at the upsampled resolution; the
    # upsample itself is fused into the kernel (never materialized).
    x_nhwc = jnp.transpose(x_nchw, (0, 2, 3, 1))
    x_pad = jnp.pad(x_nhwc, ((0, 0), (1, 1), (1, 1), (0, 0))).astype(jnp.float32)

    wk6, shift2 = _fold_parity_weights(conv_w_oihw, conv_b, bn_gamma, bn_beta,
                                       bn_mean, bn_var, eps)

    # VMEM budget from the actual working set; cap at 48 MiB so we always leave
    # headroom on v7x (64 MiB physical per TC) and never request the whole bank.
    f32 = 4
    need = (2 * (h + 2) * (w + 2) * cin * f32        # double-buffered x block
            + 2 * 2 * 6 * cin * 2 * cout * f32       # resident folded weights
            + 2 * h * w * 4 * cout * f32             # double-buffered out block
            + h * w * 9 * cin * f32                  # im2col scratch
            + 2 * h * w * 2 * cout * f32)            # f32 accumulators
    vmem_limit = int(min(48 * 1024 * 1024, max(32 * 1024 * 1024, 2 * need)))

    out_packed = pl.pallas_call(
        _upsample_conv_bn_relu_kernel,
        out_shape=jax.ShapeDtypeStruct((n, h * w, 4 * cout), x_nchw.dtype),
        grid_spec=pltpu.PrefetchScalarGridSpec(
            num_scalar_prefetch=0,
            grid=(n,),                                  # one step per image
            in_specs=[
                pl.BlockSpec((1, h + 2, w + 2, cin), lambda nb: (nb, 0, 0, 0)),
                # Constant block index -> folded weights DMA'd once, VMEM-resident.
                pl.BlockSpec((2, 6 * cin, 2 * cout), lambda nb: (0, 0, 0)),
                pl.BlockSpec((1, 2 * cout), lambda nb: (0, 0)),
            ],
            out_specs=pl.BlockSpec((1, h * w, 4 * cout), lambda nb: (nb, 0, 0)),
            scratch_shapes=[pltpu.VMEM((h, w, 9 * cin), jnp.float32)],
        ),
        compiler_params=pltpu.CompilerParams(
            dimension_semantics=("parallel",),
            vmem_limit_bytes=vmem_limit),
    )(x_pad, wk6, shift2)

    # De-interleave the row/col parities and return to NCHW in one XLA
    # transpose pass (replaces the NHWC->NCHW transpose we need anyway).
    out = out_packed.reshape(n, h, w, 2, 2, cout)      # (n, p, q, a, b, o)
    out = jnp.transpose(out, (0, 5, 1, 3, 2, 4))       # (n, o, p, a, q, b)
    return out.reshape(n, cout, 2 * h, 2 * w)


def _reference_forward(x_nchw, conv_w_oihw, conv_b,
                       bn_gamma, bn_beta, bn_mean, bn_var, eps=1e-5):
    """Pure-JAX reference (explicit upsample + lax.conv) for correctness."""
    x_up = jnp.repeat(jnp.repeat(x_nchw, 2, axis=2), 2, axis=3)
    x_nhwc = jnp.transpose(x_up, (0, 2, 3, 1))
    w_hwio = jnp.transpose(conv_w_oihw, (2, 3, 1, 0))
    y = lax.conv_general_dilated(
        x_nhwc.astype(jnp.float32), w_hwio.astype(jnp.float32),
        window_strides=(1, 1), padding="SAME",
        dimension_numbers=("NHWC", "HWIO", "NHWC"),
        precision=lax.Precision.HIGHEST)
    y = y + conv_b
    y = (y - bn_mean) / jnp.sqrt(bn_var + eps) * bn_gamma + bn_beta
    y = jnp.maximum(y, 0.0)
    return jnp.transpose(y, (0, 3, 1, 2)).astype(x_nchw.dtype)


if __name__ == "__main__":
    batch, in_ch, out_ch, hh, ww = 2, 4, 8, 16, 16

    key = jax.random.PRNGKey(0)
    k_x, k_w, k_b, k_g, k_be, k_m, k_v = jax.random.split(key, 7)

    x = jax.random.normal(k_x, (batch, in_ch, hh, ww), dtype=jnp.float32)

    # PyTorch-like uniform fan-in init for the conv.
    fan_in = in_ch * 3 * 3
    bound = 1.0 / (fan_in ** 0.5)
    conv_w = jax.random.uniform(k_w, (out_ch, in_ch, 3, 3),
                                minval=-bound, maxval=bound, dtype=jnp.float32)
    conv_b = jax.random.uniform(k_b, (out_ch,),
                                minval=-bound, maxval=bound, dtype=jnp.float32)

    # Non-trivial BN(eval) affine params / running stats to exercise the fold.
    bn_gamma = jax.random.uniform(k_g, (out_ch,), minval=0.5, maxval=1.5,
                                  dtype=jnp.float32)
    bn_beta = 0.1 * jax.random.normal(k_be, (out_ch,), dtype=jnp.float32)
    bn_mean = 0.1 * jax.random.normal(k_m, (out_ch,), dtype=jnp.float32)
    bn_var = jax.random.uniform(k_v, (out_ch,), minval=0.5, maxval=1.5,
                                dtype=jnp.float32)

    fwd = jax.jit(upsampling_layer_forward)
    out = fwd(x, conv_w, conv_b, bn_gamma, bn_beta, bn_mean, bn_var)
    out = jax.block_until_ready(out)

    assert out.shape == (batch, out_ch, 2 * hh, 2 * ww), out.shape

    ref = _reference_forward(x, conv_w, conv_b, bn_gamma, bn_beta, bn_mean, bn_var)
    max_err = float(jnp.max(jnp.abs(out - ref)))
    assert jnp.allclose(out, ref, atol=5e-4, rtol=5e-4), max_err

    print("KERNEL_OK")
</pallas_src>

<mosaic_0001>
module attributes {stable_mosaic.version = 11 : i64} {
  func.func @_upsample_conv_bn_relu_kernel(%arg0: i32, %arg1: memref<1x18x18x4xf32, #tpu.memory_space<vmem>>, %arg2: memref<2x24x16xf32, #tpu.memory_space<vmem>>, %arg3: memref<1x16xf32, #tpu.memory_space<vmem>>, %arg4: memref<1x256x32xf32, #tpu.memory_space<vmem>>, %arg5: memref<16x16x36xf32, #tpu.memory_space<vmem>>) attributes {dimension_semantics = [#tpu.dimension_semantics<parallel>], iteration_bounds = array<i64: 2>, scalar_prefetch = 0 : i64, scratch_operands = 1 : i64, tpu.core_type = #tpu.core_type<tc>, window_params = [{transform_indices = @transform_0, window_bounds = array<i64: 1, 18, 18, 4>}, {pipeline_mode = #tpu.pipeline_mode<synchronous>, transform_indices = @transform_1, window_bounds = array<i64: 2, 24, 16>}, {pipeline_mode = #tpu.pipeline_mode<synchronous>, transform_indices = @transform_2, window_bounds = array<i64: 1, 16>}, {transform_indices = @transform_3, window_bounds = array<i64: 1, 256, 32>}]} {
    %c0 = arith.constant 0 : index
    %c0_0 = arith.constant 0 : index
    %c0_1 = arith.constant 0 : index
    %c0_2 = arith.constant 0 : index
    %0 = vector.load %arg1[%c0, %c0_0, %c0_1, %c0_2] : memref<1x18x18x4xf32, #tpu.memory_space<vmem>>, vector<1x16x16x4xf32>
    %1 = vector.shape_cast %0 : vector<1x16x16x4xf32> to vector<16x16x4xf32>
    %c0_3 = arith.constant 0 : index
    %c0_4 = arith.constant 0 : index
    %c0_5 = arith.constant 0 : index
    %2 = vector.load %arg5[%c0_3, %c0_4, %c0_5] : memref<16x16x36xf32, #tpu.memory_space<vmem>>, vector<16x16x4xf32>
    tpu.vector_store %arg5[%c0_3, %c0_4, %c0_5], %1 {strides = array<i32>} : memref<16x16x36xf32, #tpu.memory_space<vmem>>, vector<16x16x4xf32>,
    %c0_6 = arith.constant 0 : index
    %c0_7 = arith.constant 0 : index
    %c1 = arith.constant 1 : index
    %c0_8 = arith.constant 0 : index
    %3 = vector.load %arg1[%c0_6, %c0_7, %c1, %c0_8] : memref<1x18x18x4xf32, #tpu.memory_space<vmem>>, vector<1x16x16x4xf32>
    %4 = vector.shape_cast %3 : vector<1x16x16x4xf32> to vector<16x16x4xf32>
    %c0_9 = arith.constant 0 : index
    %c0_10 = arith.constant 0 : index
    %c4 = arith.constant 4 : index
    %5 = vector.load %arg5[%c0_9, %c0_10, %c4] : memref<16x16x36xf32, #tpu.memory_space<vmem>>, vector<16x16x4xf32>
    tpu.vector_store %arg5[%c0_9, %c0_10, %c4], %4 {strides = array<i32>} : memref<16x16x36xf32, #tpu.memory_space<vmem>>, vector<16x16x4xf32>,
    %c0_11 = arith.constant 0 : index
    %c0_12 = arith.constant 0 : index
    %c2 = arith.constant 2 : index
    %c0_13 = arith.constant 0 : index
    %6 = vector.load %arg1[%c0_11, %c0_12, %c2, %c0_13] : memref<1x18x18x4xf32, #tpu.memory_space<vmem>>, vector<1x16x16x4xf32>
    %7 = vector.shape_cast %6 : vector<1x16x16x4xf32> to vector<16x16x4xf32>
    %c0_14 = arith.constant 0 : index
    %c0_15 = arith.constant 0 : index
    %c8 = arith.constant 8 : index
    %8 = vector.load %arg5[%c0_14, %c0_15, %c8] : memref<16x16x36xf32, #tpu.memory_space<vmem>>, vector<16x16x4xf32>
    tpu.vector_store %arg5[%c0_14, %c0_15, %c8], %7 {strides = array<i32>} : memref<16x16x36xf32, #tpu.memory_space<vmem>>, vector<16x16x4xf32>,
    %c0_16 = arith.constant 0 : index
    %c1_17 = arith.constant 1 : index
    %c0_18 = arith.constant 0 : index
    %c0_19 = arith.constant 0 : index
    %9 = vector.load %arg1[%c0_16, %c1_17, %c0_18, %c0_19] : memref<1x18x18x4xf32, #tpu.memory_space<vmem>>, vector<1x16x16x4xf32>
    %10 = vector.shape_cast %9 : vector<1x16x16x4xf32> to vector<16x16x4xf32>
    %c0_20 = arith.constant 0 : index
    %c0_21 = arith.constant 0 : index
    %c12 = arith.constant 12 : index
    %11 = vector.load %arg5[%c0_20, %c0_21, %c12] : memref<16x16x36xf32, #tpu.memory_space<vmem>>, vector<16x16x4xf32>
    tpu.vector_store %arg5[%c0_20, %c0_21, %c12], %10 {strides = array<i32>} : memref<16x16x36xf32, #tpu.memory_space<vmem>>, vector<16x16x4xf32>,
    %c0_22 = arith.constant 0 : index
    %c1_23 = arith.constant 1 : index
    %c1_24 = arith.constant 1 : index
    %c0_25 = arith.constant 0 : index
    %12 = vector.load %arg1[%c0_22, %c1_23, %c1_24, %c0_25] : memref<1x18x18x4xf32, #tpu.memory_space<vmem>>, vector<1x16x16x4xf32>
    %13 = vector.shape_cast %12 : vector<1x16x16x4xf32> to vector<16x16x4xf32>
    %c0_26 = arith.constant 0 : index
    %c0_27 = arith.constant 0 : index
    %c16 = arith.constant 16 : index
    %14 = vector.load %arg5[%c0_26, %c0_27, %c16] : memref<16x16x36xf32, #tpu.memory_space<vmem>>, vector<16x16x4xf32>
    tpu.vector_store %arg5[%c0_26, %c0_27, %c16], %13 {strides = array<i32>} : memref<16x16x36xf32, #tpu.memory_space<vmem>>, vector<16x16x4xf32>,
    %c0_28 = arith.constant 0 : index
    %c1_29 = arith.constant 1 : index
    %c2_30 = arith.constant 2 : index
    %c0_31 = arith.constant 0 : index
    %15 = vector.load %arg1[%c0_28, %c1_29, %c2_30, %c0_31] : memref<1x18x18x4xf32, #tpu.memory_space<vmem>>, vector<1x16x16x4xf32>
    %16 = vector.shape_cast %15 : vector<1x16x16x4xf32> to vector<16x16x4xf32>
    %c0_32 = arith.constant 0 : index
    %c0_33 = arith.constant 0 : index
    %c20 = arith.constant 20 : index
    %17 = vector.load %arg5[%c0_32, %c0_33, %c20] : memref<16x16x36xf32, #tpu.memory_space<vmem>>, vector<16x16x4xf32>
    tpu.vector_store %arg5[%c0_32, %c0_33, %c20], %16 {strides = array<i32>} : memref<16x16x36xf32, #tpu.memory_space<vmem>>, vector<16x16x4xf32>,
    %c0_34 = arith.constant 0 : index
    %c2_35 = arith.constant 2 : index
    %c0_36 = arith.constant 0 : index
    %c0_37 = arith.constant 0 : index
    %18 = vector.load %arg1[%c0_34, %c2_35, %c0_36, %c0_37] : memref<1x18x18x4xf32, #tpu.memory_space<vmem>>, vector<1x16x16x4xf32>
    %19 = vector.shape_cast %18 : vector<1x16x16x4xf32> to vector<16x16x4xf32>
    %c0_38 = arith.constant 0 : index
    %c0_39 = arith.constant 0 : index
    %c24 = arith.constant 24 : index
    %20 = vector.load %arg5[%c0_38, %c0_39, %c24] : memref<16x16x36xf32, #tpu.memory_space<vmem>>, vector<16x16x4xf32>
    tpu.vector_store %arg5[%c0_38, %c0_39, %c24], %19 {strides = array<i32>} : memref<16x16x36xf32, #tpu.memory_space<vmem>>, vector<16x16x4xf32>,
    %c0_40 = arith.constant 0 : index
    %c2_41 = arith.constant 2 : index
    %c1_42 = arith.constant 1 : index
    %c0_43 = arith.constant 0 : index
    %21 = vector.load %arg1[%c0_40, %c2_41, %c1_42, %c0_43] : memref<1x18x18x4xf32, #tpu.memory_space<vmem>>, vector<1x16x16x4xf32>
    %22 = vector.shape_cast %21 : vector<1x16x16x4xf32> to vector<16x16x4xf32>
    %c0_44 = arith.constant 0 : index
    %c0_45 = arith.constant 0 : index
    %c28 = arith.constant 28 : index
    %23 = vector.load %arg5[%c0_44, %c0_45, %c28] : memref<16x16x36xf32, #tpu.memory_space<vmem>>, vector<16x16x4xf32>
    tpu.vector_store %arg5[%c0_44, %c0_45, %c28], %22 {strides = array<i32>} : memref<16x16x36xf32, #tpu.memory_space<vmem>>, vector<16x16x4xf32>,
    %c0_46 = arith.constant 0 : index
    %c2_47 = arith.constant 2 : index
    %c2_48 = arith.constant 2 : index
    %c0_49 = arith.constant 0 : index
    %24 = vector.load %arg1[%c0_46, %c2_47, %c2_48, %c0_49] : memref<1x18x18x4xf32, #tpu.memory_space<vmem>>, vector<1x16x16x4xf32>
    %25 = vector.shape_cast %24 : vector<1x16x16x4xf32> to vector<16x16x4xf32>
    %c0_50 = arith.constant 0 : index
    %c0_51 = arith.constant 0 : index
    %c32 = arith.constant 32 : index
    %26 = vector.load %arg5[%c0_50, %c0_51, %c32] : memref<16x16x36xf32, #tpu.memory_space<vmem>>, vector<16x16x4xf32>
    tpu.vector_store %arg5[%c0_50, %c0_51, %c32], %25 {strides = array<i32>} : memref<16x16x36xf32, #tpu.memory_space<vmem>>, vector<16x16x4xf32>,
    %c0_52 = arith.constant 0 : index
    %c0_53 = arith.constant 0 : index
    %c0_54 = arith.constant 0 : index
    %27 = vector.load %arg5[%c0_52, %c0_53, %c0_54] : memref<16x16x36xf32, #tpu.memory_space<vmem>>, vector<16x16x36xf32>
    %28 = vector.shape_cast %27 : vector<16x16x36xf32> to vector<256x36xf32>
    %29 = vector.extract_strided_slice %28 {offsets = [0, 0], sizes = [256, 24], strides = [1, 1]} : vector<256x36xf32> to vector<256x24xf32>
    %c0_55 = arith.constant 0 : index
    %c0_56 = arith.constant 0 : index
    %c0_57 = arith.constant 0 : index
    %30 = vector.load %arg2[%c0_55, %c0_56, %c0_57] : memref<2x24x16xf32, #tpu.memory_space<vmem>>, vector<1x24x16xf32>
    %31 = vector.shape_cast %30 : vector<1x24x16xf32> to vector<24x16xf32>
    %cst = arith.constant dense<0.000000e+00> : vector<256x16xf32>
    %32 = tpu.matmul %29, %31, %cst {dimension_numbers = #tpu.dot_dimension_numbers<[1], [0], [0], [1], [0, 0, 1, 1], [], []>} : vector<256x24xf32>, vector<24x16xf32>, vector<256x16xf32> -> vector<256x16xf32>
    %33 = vector.extract_strided_slice %28 {offsets = [0, 12], sizes = [256, 24], strides = [1, 1]} : vector<256x36xf32> to vector<256x24xf32>
    %c1_58 = arith.constant 1 : index
    %c0_59 = arith.constant 0 : index
    %c0_60 = arith.constant 0 : index
    %34 = vector.load %arg2[%c1_58, %c0_59, %c0_60] : memref<2x24x16xf32, #tpu.memory_space<vmem>>, vector<1x24x16xf32>
    %35 = vector.shape_cast %34 : vector<1x24x16xf32> to vector<24x16xf32>
    %cst_61 = arith.constant dense<0.000000e+00> : vector<256x16xf32>
    %36 = tpu.matmul %33, %35, %cst_61 {dimension_numbers = #tpu.dot_dimension_numbers<[1], [0], [0], [1], [0, 0, 1, 1], [], []>} : vector<256x24xf32>, vector<24x16xf32>, vector<256x16xf32> -> vector<256x16xf32>
    %c0_62 = arith.constant 0 : index
    %c0_63 = arith.constant 0 : index
    %37 = vector.load %arg3[%c0_62, %c0_63] : memref<1x16xf32, #tpu.memory_space<vmem>>, vector<1x16xf32>
    %38 = vector.broadcast %37 : vector<1x16xf32> to vector<256x16xf32>
    %39 = arith.addf %32, %38 : vector<256x16xf32>
    %cst_64 = arith.constant 0.000000e+00 : f32
    %40 = vector.broadcast %cst_64 : f32 to vector<256x16xf32>
    %41 = arith.maximumf %39, %40 : vector<256x16xf32>
    %c0_65 = arith.constant 0 : index
    %c0_66 = arith.constant 0 : index
    %c0_67 = arith.constant 0 : index
    %42 = vector.load %arg4[%c0_65, %c0_66, %c0_67] : memref<1x256x32xf32, #tpu.memory_space<vmem>>, vector<1x256x16xf32>
    %43 = vector.shape_cast %42 : vector<1x256x16xf32> to vector<256x16xf32>
    %44 = vector.shape_cast %41 : vector<256x16xf32> to vector<1x256x16xf32>
    tpu.vector_store %arg4[%c0_65, %c0_66, %c0_67], %44 {strides = array<i32>} : memref<1x256x32xf32, #tpu.memory_space<vmem>>, vector<1x256x16xf32>,
    %45 = vector.broadcast %37 : vector<1x16xf32> to vector<256x16xf32>
    %46 = arith.addf %36, %45 : vector<256x16xf32>
    %cst_68 = arith.constant 0.000000e+00 : f32
    %47 = vector.broadcast %cst_68 : f32 to vector<256x16xf32>
    %48 = arith.maximumf %46, %47 : vector<256x16xf32>
    %c0_69 = arith.constant 0 : index
    %c0_70 = arith.constant 0 : index
    %c16_71 = arith.constant 16 : index
    %49 = vector.load %arg4[%c0_69, %c0_70, %c16_71] : memref<1x256x32xf32, #tpu.memory_space<vmem>>, vector<1x256x16xf32>
    %50 = vector.shape_cast %49 : vector<1x256x16xf32> to vector<256x16xf32>
    %51 = vector.shape_cast %48 : vector<256x16xf32> to vector<1x256x16xf32>
    tpu.vector_store %arg4[%c0_69, %c0_70, %c16_71], %51 {strides = array<i32>} : memref<1x256x32xf32, #tpu.memory_space<vmem>>, vector<1x256x16xf32>,
    return
  }
  func.func @transform_0(%arg0: i32) -> (i32, i32, i32, i32) {
    %c0_i32 = arith.constant 0 : i32
    %c0_i32_0 = arith.constant 0 : i32
    %c0_i32_1 = arith.constant 0 : i32
    %c0_i32_2 = arith.constant 0 : i32
    return %arg0, %c0_i32, %c0_i32_0, %c0_i32_1 : i32, i32, i32, i32
  }
  func.func @transform_1(%arg0: i32) -> (i32, i32, i32) {
    %c0_i32 = arith.constant 0 : i32
    %c0_i32_0 = arith.constant 0 : i32
    %c0_i32_1 = arith.constant 0 : i32
    %c0_i32_2 = arith.constant 0 : i32
    return %c0_i32, %c0_i32_0, %c0_i32_1 : i32, i32, i32
  }
  func.func @transform_2(%arg0: i32) -> (i32, i32) {
    %c0_i32 = arith.constant 0 : i32
    %c0_i32_0 = arith.constant 0 : i32
    %c0_i32_1 = arith.constant 0 : i32
    return %c0_i32, %c0_i32_0 : i32, i32
  }
  func.func @transform_3(%arg0: i32) -> (i32, i32, i32) {
    %c0_i32 = arith.constant 0 : i32
    %c0_i32_0 = arith.constant 0 : i32
    %c0_i32_1 = arith.constant 0 : i32
    return %arg0, %c0_i32, %c0_i32_0 : i32, i32, i32
  }
}

</mosaic_0001>

<bundles_post_ra>
// kernel: tile.8
= control target key start
LH: loop header
LB: loop body
LE: loop exit
PB: predicated region body
PF: predicated region fallthrough
CT: control target
= control target key end

     0   :  { %s22_s0 = inlined_call_operand.vmem [shape: f32[8], index: 0, kind: input, shape index: {}]   ;;  %s23_s1 = inlined_call_operand.vmem [shape: f32[2,8], index: 1, kind: output, shape index: {}]  }
   0x1   :  { %v4_v0 = vld [vmem:[%s22_s0] ss:$0 sm:$0xff] }
   0x2   :  { %5 = vst [vmem:[%s23_s1] sm:$0x3] %v4_v0 }

// kernel: tile.9
= control target key start
LH: loop header
LB: loop body
LE: loop exit
PB: predicated region body
PF: predicated region fallthrough
CT: control target
= control target key end

     0   :  { %vm7_vm0 = vcmask 64512   ;;  %vm13_vm1 = vcmask 130112   ;;  %s39_s0 = inlined_call_operand.vmem [shape: f32[2,8], index: 0, kind: input, shape index: {}]   ;;  %s40_s1 = inlined_call_operand.vmem [shape: f32[1,16], index: 1, kind: output, shape index: {}]  }
   0x1   :  { %v4_v0 = vld [vmem:[%s39_s0] sm:$0x3]  ;;  %s22_s0 = smov 8  }
   0x2   :  { %5 = vst [vmem:[#allocation1] sm:$0x3] %v4_v0 }
   0x9   :  { %v10_v1 = vld [vmem:[#allocation1 + $0x1] sm:$0x1]   ;;  %v6_v2 = vld [vmem:[#allocation1] sm:$0x1]  }
   0xa   :  { %11 = vrot.lane.b32.xlu0 %v10_v1, %s22_s0  ;;  %8 = vst.msk [vmem:[#allocation0] sm:$0x1] %vm7_vm0, %v6_v2  }
  0x7c   :  { %v12_v3 = vpop.permute.xlu0 %11  }
  0x7d   :  { %14 = vst.msk [vmem:[#allocation0] sm:$0x1] %vm13_vm1, %v12_v3  }
  0x84   :  { %v18_v4 = vld [vmem:[#allocation0] sm:$0x1] }
  0x85   :  { %20 = vst [vmem:[%s40_s1] sm:$0x1] %v18_v4 }

// kernel: upsampling_layer_forward.1
= control target key start
LH: loop header
LB: loop body
LE: loop exit
PB: predicated region body
PF: predicated region fallthrough
CT: control target
= control target key end

     0   :  { %s3328_s12 = smov 0   ;;  %s4724_s0 = inlined_call_operand.vmem [shape: f32[2,18,18,4], index: 0, kind: input, shape index: {}]   ;;  %s4725_s1 = inlined_call_operand.vmem [shape: f32[2,24,16], index: 1, kind: input, shape index: {}]   ;;  %s4726_s2 = inlined_call_operand.vmem [shape: f32[1,16], index: 2, kind: input, shape index: {}]   ;;  %s4727_s3 = inlined_call_operand.vmem [shape: f32[2,256,32], index: 3, kind: output, shape index: {}]  }
   0x1 LB: > { %s2816_s13 = sadd.s32 4294967295, %s3297_s12   ;;  %p2820_p0 = scmp.ge.s32.totalorder %s3297_s12, 1  ;;  %s3297_s12 = sphi %s3328_s12, %s13_s12  }
   0x2   : > { %p137_p1 = scmp.lt.s32.totalorder %s3297_s12, 3 }
   0x4   : > { %p138_p2 = pnand %p2820_p0, %p137_p1 }
   0x5   : > { %p161_p3 = scmp.lt.s32.totalorder (!%p138_p2), %s2816_s13, 1  ;;  %s3299_s18 = smov (!%p138_p2), 4   ;;  %vm203_vm0 = vcmask (!%p138_p2), 31744   ;;  %vm396_vm1 = vcmask (!%p138_p2), 64544   ;;  %vm589_vm2 = vcmask (!%p138_p2), 97344   ;;  %vm783_vm3 = vcmask (!%p138_p2), 130144  }
   0x6   : > { %141 = sbr.rel (%p138_p2) target bundleno = 1099 (0x44b), region = 32  ;;  %s3300_s19 = smov (!%p138_p2), 8   ;;  %vm976_vm4 = vcmask (!%p138_p2), 162944   ;;  %vm1169_vm5 = vcmask (!%p138_p2), 195744   ;;  %vm1363_vm6 = vcmask (!%p138_p2), 228544   ;;  %vm1556_vm7 = vcmask (!%p138_p2), 261344  }
   0x7   : > { %s3301_s20 = smov (!%p138_p2), 12   ;;  %s3302_s21 = smov (!%p138_p2), 16   ;;  %vm1749_vm8 = vcmask (!%p138_p2), 294144   ;;  %vm1828_vm9 = vcmask (!%p138_p2), 195584   ;;  %vm2182_vm10 = vcmask (!%p138_p2), 130048   ;;  %vm2728_vm11 = vcmask (!%p138_p2), 261248  }
   0x8   : > { %s3303_s22 = smov (!%p138_p2), 20   ;;  %s3304_s23 = smov (!%p138_p2), 24  }
   0x9   : > { %s3305_s28 = smov (!%p138_p2), 28   ;;  %s3306_s29 = smov (!%p138_p2), 32  }
   0xa   : > { %s3307_s11 = smov (!%p138_p2), 116  }
   0xd   : > { %s4729_s13 = smov (!%p161_p3, %s2816_s13), 1 }
   0xe   : > { %s3273_s14 = smul.u32 432, %s4729_s13  ;;  %s3086_s16 = sshll.u32 %s4729_s13, 8 }
  0x10   : > { %s3342_s17 = scalar_lea.vmem %s4724_s0, %s3273_s14 }
  0x11   : > { %v3345_v0 = vld [vmem:[%s3342_s17 + $0x19] sm:$0xff]  ;;  %v236_v1 = vld [vmem:[%s3342_s17 + $0x1] sm:$0xff]  ;;  %v237_v3 = vld [vmem:[%s3342_s17 + $0x9] sm:$0xff] }
  0x12   : > { %304 = vrot.lane.b32.xlu1 %v3345_v0, %s3299_s18  ;;  %300 = vrot.lane.b32.xlu0 %v236_v1, %s3299_s18  ;;  %v3352_v2 = vld [vmem:[%s3342_s17 + $0x21] sm:$0xff]  ;;  %v3359_v4 = vld [vmem:[%s3342_s17 + $0x39] sm:$0xff] }
  0x13   : > { %v3362_v5 = vld [vmem:[%s3342_s17 + $0x31] sm:$0xff]  ;;  %v3372_v7 = vld [vmem:[%s3342_s17 + $0x49] sm:$0xff]  ;;  %v3382_v9 = vld [vmem:[%s3342_s17 + $0x61] sm:$0xff] }
  0x14   : > { %v3369_v6 = vld [vmem:[%s3342_s17 + $0x51] sm:$0xff]  ;;  %v3379_v8 = vld [vmem:[%s3342_s17 + $0x69] sm:$0xff]  ;;  %v3389_v10 = vld [vmem:[%s3342_s17 + $0x81] sm:$0xff] }
  0x15   : > { %v3392_v11 = vld [vmem:[%s3342_s17 + $0x79] sm:$0xff]  ;;  %v3406_v15 = vld [vmem:[%s3342_s17 + $0x91] sm:$0xff]  ;;  %v172_v17 = vld [vmem:[%s3342_s17 + $0x8] sm:$0xff] }
  0x16   : > { %306 = vrot.lane.b32.xlu1 %v3352_v2, %s3299_s18  ;;  %302 = vrot.lane.b32.xlu0 %v237_v3, %s3299_s18  ;;  %v3399_v12 = vld [vmem:[%s3342_s17 + $0x18] sm:$0xff]  ;;  %v171_v13 = vld [vmem:[%s3342_s17] sm:$0xff]  ;;  %205 = vst.msk [vmem:[#allocation2 + $0x8] sm:$0xff] %vm203_vm0, %v172_v17 }
  0x17   : > { %v3403_v14 = vld [vmem:[%s3342_s17 + $0x99] sm:$0xff]  ;;  %206 = vst.msk [vmem:[#allocation2 + $0x10] sm:$0xff] %vm203_vm0, %v3399_v12  ;;  %204 = vst.msk [vmem:[#allocation2] sm:$0xff] %vm203_vm0, %v171_v13  ;;  %v251_v18 = vld [vmem:[%s3342_s17 + $0xb1] sm:$0xff] }
  0x18   : > { %v3412_v16 = vld [vmem:[%s3342_s17 + $0x20] sm:$0xff]  ;;  %v3420_v19 = vld [vmem:[%s3342_s17 + $0x38] sm:$0xff]  ;;  %v3423_v20 = vld [vmem:[%s3342_s17 + $0x30] sm:$0xff] }
  0x19   : > { %207 = vst.msk [vmem:[#allocation2 + $0x18] sm:$0xff] %vm203_vm0, %v3412_v16  ;;  %v3430_v21 = vld [vmem:[%s3342_s17 + $0xa9] sm:$0xff]  ;;  %209 = vst.msk [vmem:[#allocation2 + $0x28] sm:$0xff] %vm203_vm0, %v3420_v19  ;;  %v3448_v25 = vld [vmem:[%s3342_s17 + $0x60] sm:$0xff] }
  0x1a   : > { %310 = vrot.lane.b32.xlu1 %v3359_v4, %s3299_s18  ;;  %308 = vrot.lane.b32.xlu0 %v3362_v5, %s3299_s18  ;;  %208 = vst.msk [vmem:[#allocation2 + $0x20] sm:$0xff] %vm203_vm0, %v3423_v20  ;;  %v3437_v22 = vld [vmem:[%s3342_s17 + $0x50] sm:$0xff]  ;;  %v3442_v23 = vld [vmem:[%s3342_s17 + $0x48] sm:$0xff]  ;;  %212 = vst.msk [vmem:[#allocation2 + $0x40] sm:$0xff] %vm203_vm0, %v3448_v25 }
  0x1b   : > { %211 = vst.msk [vmem:[#allocation2 + $0x38] sm:$0xff] %vm203_vm0, %v3437_v22  ;;  %v3445_v24 = vld [vmem:[%s3342_s17 + $0x68] sm:$0xff]  ;;  %210 = vst.msk [vmem:[#allocation2 + $0x30] sm:$0xff] %vm203_vm0, %v3442_v23  ;;  %v3457_v26 = vld [vmem:[%s3342_s17 + $0x80] sm:$0xff] }
  0x1c   : > { %213 = vst.msk [vmem:[#allocation2 + $0x48] sm:$0xff] %vm203_vm0, %v3445_v24  ;;  %v3460_v27 = vld [vmem:[%s3342_s17 + $0x78] sm:$0xff]  ;;  %v253_v29 = vld [vmem:[%s3342_s17 + $0xc9] sm:$0xff]  ;;  %v252_v30 = vld [vmem:[%s3342_s17 + $0xc1] sm:$0xff] }
  0x1d   : > { %v3463_v28 = vld [vmem:[%s3342_s17 + $0x98] sm:$0xff]  ;;  %215 = vst.msk [vmem:[#allocation2 + $0x58] sm:$0xff] %vm203_vm0, %v3457_v26  ;;  %214 = vst.msk [vmem:[#allocation2 + $0x50] sm:$0xff] %vm203_vm0, %v3460_v27  ;;  %v3474_v31 = vld [vmem:[%s3342_s17 + $0x90] sm:$0xff] }
  0x1e   : > { %314 = vrot.lane.b32.xlu1 %v3369_v6, %s3299_s18  ;;  %312 = vrot.lane.b32.xlu0 %v3372_v7, %s3299_s18  ;;  %217 = vst.msk [vmem:[#allocation2 + $0x68] sm:$0xff] %vm203_vm0, %v3463_v28  ;;  %v3477_v32 = vld [vmem:[%s3342_s17 + $0xb0] sm:$0xff]  ;;  %v3480_v33 = vld [vmem:[%s3342_s17 + $0xa8] sm:$0xff]  ;;  %216 = vst.msk [vmem:[#allocation2 + $0x60] sm:$0xff] %vm203_vm0, %v3474_v31 }
  0x1f   : > { %219 = vst.msk [vmem:[#allocation2 + $0x78] sm:$0xff] %vm203_vm0, %v3477_v32  ;;  %218 = vst.msk [vmem:[#allocation2 + $0x70] sm:$0xff] %vm203_vm0, %v3480_v33  ;;  %v3492_v34 = vld [vmem:[%s3342_s17 + $0xc8] sm:$0xff]  ;;  %v3495_v35 = vld [vmem:[%s3342_s17 + $0xc0] sm:$0xff] }
  0x20   : > { %221 = vst.msk [vmem:[#allocation2 + $0x88] sm:$0xff] %vm203_vm0, %v3492_v34  ;;  %220 = vst.msk [vmem:[#allocation2 + $0x80] sm:$0xff] %vm203_vm0, %v3495_v35  ;;  %v3502_v36 = vld [vmem:[%s3342_s17 + $0xe0] sm:$0xff]  ;;  %v3505_v37 = vld [vmem:[%s3342_s17 + $0xd8] sm:$0xff] }
  0x21   : > { %v3508_v38 = vld [vmem:[%s3342_s17 + $0xf8] sm:$0xff]  ;;  %223 = vst.msk [vmem:[#allocation2 + $0x98] sm:$0xff] %vm203_vm0, %v3502_v36  ;;  %222 = vst.msk [vmem:[#allocation2 + $0x90] sm:$0xff] %vm203_vm0, %v3505_v37  ;;  %v3517_v39 = vld [vmem:[%s3342_s17 + $0xf0] sm:$0xff] }
  0x22   : > { %318 = vrot.lane.b32.xlu1 %v3379_v8, %s3299_s18  ;;  %316 = vrot.lane.b32.xlu0 %v3382_v9, %s3299_s18  ;;  %225 = vst.msk [vmem:[#allocation2 + $0xa8] sm:$0xff] %vm203_vm0, %v3508_v38  ;;  %v3520_v40 = vld [vmem:[%s3342_s17 + $0x110] sm:$0xff]  ;;  %v3523_v41 = vld [vmem:[%s3342_s17 + $0x108] sm:$0xff]  ;;  %224 = vst.msk [vmem:[#allocation2 + $0xa0] sm:$0xff] %vm203_vm0, %v3517_v39 }
  0x23   : > { %227 = vst.msk [vmem:[#allocation2 + $0xb8] sm:$0xff] %vm203_vm0, %v3520_v40  ;;  %226 = vst.msk [vmem:[#allocation2 + $0xb0] sm:$0xff] %vm203_vm0, %v3523_v41  ;;  %v255_v42 = vld [vmem:[%s3342_s17 + $0xe1] sm:$0xff]  ;;  %v254_v43 = vld [vmem:[%s3342_s17 + $0xd9] sm:$0xff] }
  0x24   : > { %v3536_v44 = vld [vmem:[%s3342_s17 + $0x120] sm:$0xff]  ;;  %v3539_v45 = vld [vmem:[%s3342_s17 + $0x128] sm:$0xff]  ;;  %v256_v47 = vld [vmem:[%s3342_s17 + $0xf1] sm:$0xff] }
  0x25   : > { %228 = vst.msk [vmem:[#allocation2 + $0xc0] sm:$0xff] %vm203_vm0, %v3536_v44  ;;  %229 = vst.msk [vmem:[#allocation2 + $0xc8] sm:$0xff] %vm203_vm0, %v3539_v45  ;;  %v257_v46 = vld [vmem:[%s3342_s17 + $0xf9] sm:$0xff]  ;;  %v259_v50 = vld [vmem:[%s3342_s17 + $0x111] sm:$0xff] }
  0x26   : > { %322 = vrot.lane.b32.xlu1 %v3389_v10, %s3299_s18  ;;  %320 = vrot.lane.b32.xlu0 %v3392_v11, %s3299_s18  ;;  %v197_v48 = vld [vmem:[%s3342_s17 + $0x138] sm:$0xff]  ;;  %v198_v49 = vld [vmem:[%s3342_s17 + $0x140] sm:$0xff] }
  0x27   : > { %230 = vst.msk [vmem:[#allocation2 + $0xd0] sm:$0xff] %vm203_vm0, %v197_v48  ;;  %231 = vst.msk [vmem:[#allocation2 + $0xd8] sm:$0xff] %vm203_vm0, %v198_v49  ;;  %v258_v51 = vld [vmem:[%s3342_s17 + $0x109] sm:$0xff]  ;;  %v200_v53 = vld [vmem:[%s3342_s17 + $0x158] sm:$0xff] }
  0x28   : > { %v199_v52 = vld [vmem:[%s3342_s17 + $0x150] sm:$0xff]  ;;  %233 = vst.msk [vmem:[#allocation2 + $0xe8] sm:$0xff] %vm203_vm0, %v200_v53  ;;  %v260_v55 = vld [vmem:[%s3342_s17 + $0x121] sm:$0xff]  ;;  %v262_v59 = vld [vmem:[%s3342_s17 + $0x139] sm:$0xff] }
  0x29   : > { %232 = vst.msk [vmem:[#allocation2 + $0xe0] sm:$0xff] %vm203_vm0, %v199_v52  ;;  %v261_v54 = vld [vmem:[%s3342_s17 + $0x129] sm:$0xff]  ;;  %v263_v58 = vld [vmem:[%s3342_s17 + $0x141] sm:$0xff]  ;;  %v265_v60 = vld [vmem:[%s3342_s17 + $0x159] sm:$0xff] }
  0x2a   : > { %326 = vrot.lane.b32.xlu1 %v3403_v14, %s3299_s18  ;;  %324 = vrot.lane.b32.xlu0 %v3406_v15, %s3299_s18  ;;  %v201_v56 = vld [vmem:[%s3342_s17 + $0x168] sm:$0xff]  ;;  %v202_v57 = vld [vmem:[%s3342_s17 + $0x170] sm:$0xff] }
  0x2b   : > { %234 = vst.msk [vmem:[#allocation2 + $0xf0] sm:$0xff] %vm203_vm0, %v201_v56  ;;  %235 = vst.msk [vmem:[#allocation2 + $0xf8] sm:$0xff] %vm203_vm0, %v202_v57  ;;  %v264_v61 = vld [vmem:[%s3342_s17 + $0x151] sm:$0xff]  ;;  %v266_v63 = vld [vmem:[%s3342_s17 + $0x169] sm:$0xff] }
  0x2c   : > { %v267_v62 = vld [vmem:[%s3342_s17 + $0x171] sm:$0xff]  ;;  %v429_v3 = vld [vmem:[%s3342_s17 + $0x2] sm:$0xff]  ;;  %v3591_v17 = vld [vmem:[%s3342_s17 + $0x1a] sm:$0xff] }
  0x2d   : > { %v430_v1 = vld [vmem:[%s3342_s17 + $0xa] sm:$0xff]  ;;  %v3588_v13 = vld [vmem:[%s3342_s17 + $0x22] sm:$0xff]  ;;  %v3631_v48 = vld [vmem:[%s3342_s17 + $0x7a] sm:$0xff] }
  0x2e   : > { %330 = vrot.lane.b32.xlu1 %v251_v18, %s3299_s18  ;;  %328 = vrot.lane.b32.xlu0 %v3430_v21, %s3299_s18  ;;  %v3598_v18 = vld [vmem:[%s3342_s17 + $0x3a] sm:$0xff]  ;;  %v3651_v52 = vld [vmem:[%s3342_s17 + $0xaa] sm:$0xff] }
  0x2f   : > { %v3638_v49 = vld [vmem:[%s3342_s17 + $0x9a] sm:$0xff]  ;;  %v446_v53 = vld [vmem:[%s3342_s17 + $0xca] sm:$0xff] }
  0x30   : > { %v447_v56 = vld [vmem:[%s3342_s17 + $0xda] sm:$0xff] }
  0x31   : > { %v450_v57 = vld [vmem:[%s3342_s17 + $0xfa] sm:$0xff] }
  0x32   : > { %334 = vrot.lane.b32.xlu1 %v253_v29, %s3299_s18  ;;  %332 = vrot.lane.b32.xlu0 %v252_v30, %s3299_s18  ;;  %v3601_v29 = vld [vmem:[%s3342_s17 + $0x32] sm:$0xff] }
  0x33   : > { %v3608_v30 = vld [vmem:[%s3342_s17 + $0x52] sm:$0xff] }
  0x36   : > { %338 = vrot.lane.b32.xlu1 %v255_v42, %s3299_s18  ;;  %336 = vrot.lane.b32.xlu0 %v254_v43, %s3299_s18  ;;  %v3611_v42 = vld [vmem:[%s3342_s17 + $0x4a] sm:$0xff] }
  0x37   : > { %v3618_v43 = vld [vmem:[%s3342_s17 + $0x6a] sm:$0xff] }
  0x3a   : > { %342 = vrot.lane.b32.xlu1 %v257_v46, %s3299_s18  ;;  %340 = vrot.lane.b32.xlu0 %v256_v47, %s3299_s18  ;;  %v3621_v46 = vld [vmem:[%s3342_s17 + $0x62] sm:$0xff] }
  0x3b   : > { %v3628_v47 = vld [vmem:[%s3342_s17 + $0x82] sm:$0xff] }
  0x3e   : > { %346 = vrot.lane.b32.xlu1 %v259_v50, %s3299_s18  ;;  %344 = vrot.lane.b32.xlu0 %v258_v51, %s3299_s18  ;;  %v3641_v50 = vld [vmem:[%s3342_s17 + $0x92] sm:$0xff] }
  0x3f   : > { %v3648_v51 = vld [vmem:[%s3342_s17 + $0xb2] sm:$0xff] }
  0x42   : > { %350 = vrot.lane.b32.xlu1 %v261_v54, %s3299_s18  ;;  %348 = vrot.lane.b32.xlu0 %v260_v55, %s3299_s18  ;;  %v3659_v54 = vld [vmem:[%s3342_s17 + $0xc2] sm:$0xff] }
  0x43   : > { %v448_v55 = vld [vmem:[%s3342_s17 + $0xe2] sm:$0xff] }
  0x46   : > { %354 = vrot.lane.b32.xlu1 %v263_v58, %s3299_s18  ;;  %352 = vrot.lane.b32.xlu0 %v262_v59, %s3299_s18  ;;  %v449_v58 = vld [vmem:[%s3342_s17 + $0xf2] sm:$0xff] }
  0x47   : > { %v452_v59 = vld [vmem:[%s3342_s17 + $0x112] sm:$0xff] }
  0x4a   : > { %358 = vrot.lane.b32.xlu1 %v265_v60, %s3299_s18  ;;  %356 = vrot.lane.b32.xlu0 %v264_v61, %s3299_s18  ;;  %v451_v60 = vld [vmem:[%s3342_s17 + $0x10a] sm:$0xff] }
  0x4b   : > { %v454_v61 = vld [vmem:[%s3342_s17 + $0x12a] sm:$0xff] }
  0x4e   : > { %362 = vrot.lane.b32.xlu1 %v267_v62, %s3299_s18  ;;  %360 = vrot.lane.b32.xlu0 %v266_v63, %s3299_s18  ;;  %v453_v62 = vld [vmem:[%s3342_s17 + $0x122] sm:$0xff] }
  0x4f   : > { %v456_v63 = vld [vmem:[%s3342_s17 + $0x142] sm:$0xff] }
  0x52   : > { %495 = vrot.lane.b32.xlu1 %v430_v1, %s3300_s19  ;;  %493 = vrot.lane.b32.xlu0 %v429_v3, %s3300_s19  ;;  %v455_v1 = vld [vmem:[%s3342_s17 + $0x13a] sm:$0xff] }
  0x56   : > { %499 = vrot.lane.b32.xlu1 %v3588_v13, %s3300_s19  ;;  %497 = vrot.lane.b32.xlu0 %v3591_v17, %s3300_s19 }
  0x5a   : > { %503 = vrot.lane.b32.xlu1 %v3598_v18, %s3300_s19  ;;  %501 = vrot.lane.b32.xlu0 %v3601_v29, %s3300_s19 }
  0x5e   : > { %507 = vrot.lane.b32.xlu1 %v3608_v30, %s3300_s19  ;;  %505 = vrot.lane.b32.xlu0 %v3611_v42, %s3300_s19 }
  0x62   : > { %511 = vrot.lane.b32.xlu1 %v3618_v43, %s3300_s19  ;;  %509 = vrot.lane.b32.xlu0 %v3621_v46, %s3300_s19 }
  0x66   : > { %515 = vrot.lane.b32.xlu1 %v3628_v47, %s3300_s19  ;;  %513 = vrot.lane.b32.xlu0 %v3631_v48, %s3300_s19 }
  0x6a   : > { %519 = vrot.lane.b32.xlu1 %v3638_v49, %s3300_s19  ;;  %517 = vrot.lane.b32.xlu0 %v3641_v50, %s3300_s19 }
  0x6e   : > { %523 = vrot.lane.b32.xlu1 %v3648_v51, %s3300_s19  ;;  %521 = vrot.lane.b32.xlu0 %v3651_v52, %s3300_s19 }
  0x72   : > { %527 = vrot.lane.b32.xlu1 %v446_v53, %s3300_s19  ;;  %525 = vrot.lane.b32.xlu0 %v3659_v54, %s3300_s19 }
  0x76   : > { %531 = vrot.lane.b32.xlu1 %v448_v55, %s3300_s19  ;;  %529 = vrot.lane.b32.xlu0 %v447_v56, %s3300_s19  ;;  %v458_v55 = vld [vmem:[%s3342_s17 + $0x15a] sm:$0xff]  ;;  %v457_v56 = vld [vmem:[%s3342_s17 + $0x152] sm:$0xff] }
  0x7a   : > { %535 = vrot.lane.b32.xlu1 %v450_v57, %s3300_s19  ;;  %533 = vrot.lane.b32.xlu0 %v449_v58, %s3300_s19 }
  0x7e   : > { %539 = vrot.lane.b32.xlu1 %v452_v59, %s3300_s19  ;;  %537 = vrot.lane.b32.xlu0 %v451_v60, %s3300_s19  ;;  %v460_v59 = vld [vmem:[%s3342_s17 + $0x172] sm:$0xff]  ;;  %v459_v60 = vld [vmem:[%s3342_s17 + $0x16a] sm:$0xff] }
  0x82   : > { %543 = vrot.lane.b32.xlu1 %v454_v61, %s3300_s19  ;;  %541 = vrot.lane.b32.xlu0 %v453_v62, %s3300_s19 }
  0x84   : > { %v305_v3 = vpop.permute.xlu1 %304  ;;  %v301_v53 = vpop.permute.xlu0 %300 }
  0x85   : > { %399 = vst.msk [vmem:[#allocation2 + $0x10] sm:$0xff] %vm396_vm1, %v305_v3  ;;  %397 = vst.msk [vmem:[#allocation2] sm:$0xff] %vm396_vm1, %v301_v53 }
  0x86   : > { %547 = vrot.lane.b32.xlu1 %v456_v63, %s3300_s19  ;;  %545 = vrot.lane.b32.xlu0 %v455_v1, %s3300_s19 }
  0x88   : > { %v307_v57 = vpop.permute.xlu1 %306  ;;  %v303_v58 = vpop.permute.xlu0 %302 }
  0x89   : > { %400 = vst.msk [vmem:[#allocation2 + $0x18] sm:$0xff] %vm396_vm1, %v307_v57  ;;  %398 = vst.msk [vmem:[#allocation2 + $0x8] sm:$0xff] %vm396_vm1, %v303_v58 }
  0x8a   : > { %551 = vrot.lane.b32.xlu1 %v458_v55, %s3300_s19  ;;  %549 = vrot.lane.b32.xlu0 %v457_v56, %s3300_s19 }
  0x8c   : > { %v311_v61 = vpop.permute.xlu1 %310  ;;  %v309_v62 = vpop.permute.xlu0 %308 }
  0x8d   : > { %402 = vst.msk [vmem:[#allocation2 + $0x28] sm:$0xff] %vm396_vm1, %v311_v61  ;;  %401 = vst.msk [vmem:[#allocation2 + $0x20] sm:$0xff] %vm396_vm1, %v309_v62 }
  0x8e   : > { %555 = vrot.lane.b32.xlu1 %v460_v59, %s3300_s19  ;;  %553 = vrot.lane.b32.xlu0 %v459_v60, %s3300_s19  ;;  %s4385_s19 = scalar_lea.vmem %s4727_s3, %s3086_s16 }
  0x90   : > { %v315_v63 = vpop.permute.xlu1 %314  ;;  %v313_v1 = vpop.permute.xlu0 %312 }
  0x91   : > { %404 = vst.msk [vmem:[#allocation2 + $0x38] sm:$0xff] %vm396_vm1, %v315_v63  ;;  %403 = vst.msk [vmem:[#allocation2 + $0x30] sm:$0xff] %vm396_vm1, %v313_v1 }
  0x92   : > { %689 = vrot.lane.b32.xlu1 %v3412_v16, %s3301_s20  ;;  %687 = vrot.lane.b32.xlu0 %v3399_v12, %s3301_s20 }
  0x94   : > { %v319_v3 = vpop.permute.xlu1 %318  ;;  %v317_v53 = vpop.permute.xlu0 %316 }
  0x95   : > { %406 = vst.msk [vmem:[#allocation2 + $0x48] sm:$0xff] %vm396_vm1, %v319_v3  ;;  %405 = vst.msk [vmem:[#allocation2 + $0x40] sm:$0xff] %vm396_vm1, %v317_v53 }
  0x96   : > { %693 = vrot.lane.b32.xlu1 %v3420_v19, %s3301_s20  ;;  %691 = vrot.lane.b32.xlu0 %v3423_v20, %s3301_s20 }
  0x98   : > { %v323_v55 = vpop.permute.xlu1 %322  ;;  %v321_v56 = vpop.permute.xlu0 %320 }
  0x99   : > { %408 = vst.msk [vmem:[#allocation2 + $0x58] sm:$0xff] %vm396_vm1, %v323_v55  ;;  %407 = vst.msk [vmem:[#allocation2 + $0x50] sm:$0xff] %vm396_vm1, %v321_v56 }
  0x9a   : > { %697 = vrot.lane.b32.xlu1 %v3437_v22, %s3301_s20  ;;  %695 = vrot.lane.b32.xlu0 %v3442_v23, %s3301_s20 }
  0x9c   : > { %v327_v12 = vpop.permute.xlu1 %326  ;;  %v325_v16 = vpop.permute.xlu0 %324 }
  0x9d   : > { %410 = vst.msk [vmem:[#allocation2 + $0x68] sm:$0xff] %vm396_vm1, %v327_v12  ;;  %409 = vst.msk [vmem:[#allocation2 + $0x60] sm:$0xff] %vm396_vm1, %v325_v16 }
  0x9e   : > { %701 = vrot.lane.b32.xlu1 %v3445_v24, %s3301_s20  ;;  %699 = vrot.lane.b32.xlu0 %v3448_v25, %s3301_s20 }
  0xa0   : > { %v331_v57 = vpop.permute.xlu1 %330  ;;  %v329_v58 = vpop.permute.xlu0 %328 }
  0xa1   : > { %412 = vst.msk [vmem:[#allocation2 + $0x78] sm:$0xff] %vm396_vm1, %v331_v57  ;;  %411 = vst.msk [vmem:[#allocation2 + $0x70] sm:$0xff] %vm396_vm1, %v329_v58 }
  0xa2   : > { %705 = vrot.lane.b32.xlu1 %v3457_v26, %s3301_s20  ;;  %703 = vrot.lane.b32.xlu0 %v3460_v27, %s3301_s20 }
  0xa4   : > { %v335_v59 = vpop.permute.xlu1 %334  ;;  %v333_v60 = vpop.permute.xlu0 %332 }
  0xa5   : > { %414 = vst.msk [vmem:[#allocation2 + $0x88] sm:$0xff] %vm396_vm1, %v335_v59  ;;  %413 = vst.msk [vmem:[#allocation2 + $0x80] sm:$0xff] %vm396_vm1, %v333_v60 }
  0xa6   : > { %709 = vrot.lane.b32.xlu1 %v3463_v28, %s3301_s20  ;;  %707 = vrot.lane.b32.xlu0 %v3474_v31, %s3301_s20 }
  0xa8   : > { %v339_v61 = vpop.permute.xlu1 %338  ;;  %v337_v62 = vpop.permute.xlu0 %336 }
  0xa9   : > { %416 = vst.msk [vmem:[#allocation2 + $0x98] sm:$0xff] %vm396_vm1, %v339_v61  ;;  %415 = vst.msk [vmem:[#allocation2 + $0x90] sm:$0xff] %vm396_vm1, %v337_v62 }
  0xaa   : > { %713 = vrot.lane.b32.xlu1 %v3477_v32, %s3301_s20  ;;  %711 = vrot.lane.b32.xlu0 %v3480_v33, %s3301_s20 }
  0xac   : > { %v343_v63 = vpop.permute.xlu1 %342  ;;  %v341_v1 = vpop.permute.xlu0 %340 }
  0xad   : > { %418 = vst.msk [vmem:[#allocation2 + $0xa8] sm:$0xff] %vm396_vm1, %v343_v63  ;;  %417 = vst.msk [vmem:[#allocation2 + $0xa0] sm:$0xff] %vm396_vm1, %v341_v1 }
  0xae   : > { %717 = vrot.lane.b32.xlu1 %v3492_v34, %s3301_s20  ;;  %715 = vrot.lane.b32.xlu0 %v3495_v35, %s3301_s20 }
  0xb0   : > { %v347_v3 = vpop.permute.xlu1 %346  ;;  %v345_v53 = vpop.permute.xlu0 %344 }
  0xb1   : > { %420 = vst.msk [vmem:[#allocation2 + $0xb8] sm:$0xff] %vm396_vm1, %v347_v3  ;;  %419 = vst.msk [vmem:[#allocation2 + $0xb0] sm:$0xff] %vm396_vm1, %v345_v53  ;;  %v1816_v53 = vld [vmem:[%s4725_s1 + $0x10] sm:$0xff] }
  0xb2   : > { %721 = vrot.lane.b32.xlu1 %v3502_v36, %s3301_s20  ;;  %719 = vrot.lane.b32.xlu0 %v3505_v37, %s3301_s20 }
  0xb4   : > { %v351_v55 = vpop.permute.xlu1 %350  ;;  %v349_v56 = vpop.permute.xlu0 %348 }
  0xb5   : > { %422 = vst.msk [vmem:[#allocation2 + $0xc8] sm:$0xff] %vm396_vm1, %v351_v55  ;;  %421 = vst.msk [vmem:[#allocation2 + $0xc0] sm:$0xff] %vm396_vm1, %v349_v56 }
  0xb6   : > { %725 = vrot.lane.b32.xlu1 %v3508_v38, %s3301_s20  ;;  %723 = vrot.lane.b32.xlu0 %v3517_v39, %s3301_s20 }
  0xb8   : > { %v355_v12 = vpop.permute.xlu1 %354  ;;  %v353_v16 = vpop.permute.xlu0 %352 }
  0xb9   : > { %424 = vst.msk [vmem:[#allocation2 + $0xd8] sm:$0xff] %vm396_vm1, %v355_v12  ;;  %423 = vst.msk [vmem:[#allocation2 + $0xd0] sm:$0xff] %vm396_vm1, %v353_v16 }
  0xba   : > { %729 = vrot.lane.b32.xlu1 %v3520_v40, %s3301_s20  ;;  %727 = vrot.lane.b32.xlu0 %v3523_v41, %s3301_s20 }
  0xbc   : > { %v359_v57 = vpop.permute.xlu1 %358  ;;  %v357_v58 = vpop.permute.xlu0 %356 }
  0xbd   : > { %426 = vst.msk [vmem:[#allocation2 + $0xe8] sm:$0xff] %vm396_vm1, %v359_v57  ;;  %425 = vst.msk [vmem:[#allocation2 + $0xe0] sm:$0xff] %vm396_vm1, %v357_v58 }
  0xbe   : > { %733 = vrot.lane.b32.xlu1 %v3539_v45, %s3301_s20  ;;  %731 = vrot.lane.b32.xlu0 %v3536_v44, %s3301_s20 }
  0xc0   : > { %v363_v59 = vpop.permute.xlu1 %362  ;;  %v361_v60 = vpop.permute.xlu0 %360 }
  0xc1   : > { %428 = vst.msk [vmem:[#allocation2 + $0xf8] sm:$0xff] %vm396_vm1, %v363_v59  ;;  %427 = vst.msk [vmem:[#allocation2 + $0xf0] sm:$0xff] %vm396_vm1, %v361_v60 }
  0xc2   : > { %882 = vrot.lane.b32.xlu1 %v3352_v2, %s3302_s21  ;;  %880 = vrot.lane.b32.xlu0 %v3345_v0, %s3302_s21 }
  0xc4   : > { %v496_v61 = vpop.permute.xlu1 %495  ;;  %v494_v62 = vpop.permute.xlu0 %493 }
  0xc5   : > { %591 = vst.msk [vmem:[#allocation2 + $0x8] sm:$0xff] %vm589_vm2, %v496_v61  ;;  %590 = vst.msk [vmem:[#allocation2] sm:$0xff] %vm589_vm2, %v494_v62 }
  0xc6   : > { %1075 = vrot.lane.b32.xlu1 %v3588_v13, %s3303_s22  ;;  %1073 = vrot.lane.b32.xlu0 %v3591_v17, %s3303_s22  ;;  %v1814_v13 = vld [vmem:[%s4725_s1] sm:$0xff]  ;;  %v1815_v17 = vld [vmem:[%s4725_s1 + $0x8] sm:$0xff] }
  0xc7   : > { %v3265_v3 = vpack.c.bf16 %v1815_v17, %v1814_v13 }
  0xc8   : > { %v500_v63 = vpop.permute.xlu1 %499  ;;  %v498_v1 = vpop.permute.xlu0 %497 }
  0xc9   : > { %593 = vst.msk [vmem:[#allocation2 + $0x18] sm:$0xff] %vm589_vm2, %v500_v63  ;;  %592 = vst.msk [vmem:[#allocation2 + $0x10] sm:$0xff] %vm589_vm2, %v498_v1  ;;  %3266 = vmatprep.subr.bf16.mxu0 %v3265_v3 }
  0xca   : > { %1269 = vrot.lane.b32.xlu1 %v3420_v19, %s3304_s23  ;;  %1267 = vrot.lane.b32.xlu0 %v3423_v20, %s3304_s23 }
  0xcb   : > { %3268 = vmatpush3.bf16.msra.mxu0 %v3265_v3 }
  0xcc   : > { %v504_v0 = vpop.permute.xlu1 %503  ;;  %v502_v2 = vpop.permute.xlu0 %501  ;;  %3161 = vmatprep.subr.mxu0 %v1816_v53 }
  0xcd   : > { %595 = vst.msk [vmem:[#allocation2 + $0x28] sm:$0xff] %vm589_vm2, %v504_v0  ;;  %594 = vst.msk [vmem:[#allocation2 + $0x20] sm:$0xff] %vm589_vm2, %v502_v2 }
  0xce   : > { %884 = vrot.lane.b32.xlu1 %v3362_v5, %s3302_s21  ;;  %1460 = vrot.lane.b32.xlu0 %v3362_v5, %s3305_s28 }
  0xcf   : > { %3162 = vmatpush3.msra.mxu0 %v1816_v53 }
  0xd0   : > { %v508_v19 = vpop.permute.xlu1 %507  ;;  %v506_v20 = vpop.permute.xlu0 %505 }
  0xd1   : > { %597 = vst.msk [vmem:[#allocation2 + $0x38] sm:$0xff] %vm589_vm2, %v508_v19  ;;  %596 = vst.msk [vmem:[#allocation2 + $0x30] sm:$0xff] %vm589_vm2, %v506_v20 }
  0xd2   : > { %1653 = vrot.lane.b32.xlu1 %v3601_v29, %s3306_s29  ;;  %1462 = vrot.lane.b32.xlu0 %v3359_v4, %s3305_s28 }
  0xd4   : > { %v512_v5 = vpop.permute.xlu1 %511  ;;  %v510_v55 = vpop.permute.xlu0 %509 }
  0xd5   : > { %599 = vst.msk [vmem:[#allocation2 + $0x48] sm:$0xff] %vm589_vm2, %v512_v5  ;;  %598 = vst.msk [vmem:[#allocation2 + $0x40] sm:$0xff] %vm589_vm2, %v510_v55 }
  0xd6   : > { %1077 = vrot.lane.b32.xlu1 %v3601_v29, %s3303_s22  ;;  %886 = vrot.lane.b32.xlu0 %v3359_v4, %s3302_s21 }
  0xd8   : > { %v516_v56 = vpop.permute.xlu1 %515  ;;  %v514_v12 = vpop.permute.xlu0 %513 }
  0xd9   : > { %601 = vst.msk [vmem:[#allocation2 + $0x58] sm:$0xff] %vm589_vm2, %v516_v56  ;;  %600 = vst.msk [vmem:[#allocation2 + $0x50] sm:$0xff] %vm589_vm2, %v514_v12 }
  0xda   : > { %1079 = vrot.lane.b32.xlu1 %v3598_v18, %s3303_s22  ;;  %1655 = vrot.lane.b32.xlu0 %v3598_v18, %s3306_s29 }
  0xdc   : > { %v520_v16 = vpop.permute.xlu1 %519  ;;  %v518_v57 = vpop.permute.xlu0 %517 }
  0xdd   : > { %603 = vst.msk [vmem:[#allocation2 + $0x68] sm:$0xff] %vm589_vm2, %v520_v16  ;;  %602 = vst.msk [vmem:[#allocation2 + $0x60] sm:$0xff] %vm589_vm2, %v518_v57  ;;  %v2870_v57 = vld [vmem:[%s3342_s17 + $0xc1] sm:$0xff] }
  0xde   : > { %1273 = vrot.lane.b32.xlu1 %v3437_v22, %s3304_s23  ;;  %1271 = vrot.lane.b32.xlu0 %v3442_v23, %s3304_s23 }
  0xe0   : > { %v524_v4 = vpop.permute.xlu1 %523  ;;  %v522_v29 = vpop.permute.xlu0 %521 }
  0xe1   : > { %605 = vst.msk [vmem:[#allocation2 + $0x78] sm:$0xff] %vm589_vm2, %v524_v4  ;;  %604 = vst.msk [vmem:[#allocation2 + $0x70] sm:$0xff] %vm589_vm2, %v522_v29 }
  0xe2   : > { %888 = vrot.lane.b32.xlu1 %v3372_v7, %s3302_s21  ;;  %1464 = vrot.lane.b32.xlu0 %v3372_v7, %s3305_s28 }
  0xe4   : > { %v528_v18 = vpop.permute.xlu1 %527  ;;  %v526_v58 = vpop.permute.xlu0 %525 }
  0xe5   : > { %607 = vst.msk [vmem:[#allocation2 + $0x88] sm:$0xff] %vm589_vm2, %v528_v18  ;;  %606 = vst.msk [vmem:[#allocation2 + $0x80] sm:$0xff] %vm589_vm2, %v526_v58 }
  0xe6   : > { %1657 = vrot.lane.b32.xlu1 %v3611_v42, %s3306_s29  ;;  %1466 = vrot.lane.b32.xlu0 %v3369_v6, %s3305_s28 }
  0xe8   : > { %v532_v22 = vpop.permute.xlu1 %531  ;;  %v530_v23 = vpop.permute.xlu0 %529 }
  0xe9   : > { %609 = vst.msk [vmem:[#allocation2 + $0x98] sm:$0xff] %vm589_vm2, %v532_v22  ;;  %608 = vst.msk [vmem:[#allocation2 + $0x90] sm:$0xff] %vm589_vm2, %v530_v23  ;;  %v2903_v23 = vld [vmem:[%s3342_s17 + $0xca] sm:$0xff] }
  0xea   : > { %1081 = vrot.lane.b32.xlu1 %v3611_v42, %s3303_s22  ;;  %890 = vrot.lane.b32.xlu0 %v3369_v6, %s3302_s21 }
  0xec   : > { %v536_v7 = vpop.permute.xlu1 %535  ;;  %v534_v59 = vpop.permute.xlu0 %533 }
  0xed   : > { %611 = vst.msk [vmem:[#allocation2 + $0xa8] sm:$0xff] %vm589_vm2, %v536_v7  ;;  %610 = vst.msk [vmem:[#allocation2 + $0xa0] sm:$0xff] %vm589_vm2, %v534_v59 }
  0xee   : > { %1083 = vrot.lane.b32.xlu1 %v3608_v30, %s3303_s22  ;;  %1659 = vrot.lane.b32.xlu0 %v3608_v30, %s3306_s29 }
  0xf0   : > { %v540_v60 = vpop.permute.xlu1 %539  ;;  %v538_v61 = vpop.permute.xlu0 %537 }
  0xf1   : > { %613 = vst.msk [vmem:[#allocation2 + $0xb8] sm:$0xff] %vm589_vm2, %v540_v60  ;;  %612 = vst.msk [vmem:[#allocation2 + $0xb0] sm:$0xff] %vm589_vm2, %v538_v61 }
  0xf2   : > { %1277 = vrot.lane.b32.xlu1 %v3445_v24, %s3304_s23  ;;  %1275 = vrot.lane.b32.xlu0 %v3448_v25, %s3304_s23 }
  0xf4   : > { %v544_v6 = vpop.permute.xlu1 %543  ;;  %v542_v42 = vpop.permute.xlu0 %541 }
  0xf5   : > { %615 = vst.msk [vmem:[#allocation2 + $0xc8] sm:$0xff] %vm589_vm2, %v544_v6  ;;  %614 = vst.msk [vmem:[#allocation2 + $0xc0] sm:$0xff] %vm589_vm2, %v542_v42 }
  0xf6   : > { %892 = vrot.lane.b32.xlu1 %v3382_v9, %s3302_s21  ;;  %1468 = vrot.lane.b32.xlu0 %v3382_v9, %s3305_s28 }
  0xf8   : > { %v548_v30 = vpop.permute.xlu1 %547  ;;  %v546_v62 = vpop.permute.xlu0 %545 }
  0xf9   : > { %617 = vst.msk [vmem:[#allocation2 + $0xd8] sm:$0xff] %vm589_vm2, %v548_v30  ;;  %616 = vst.msk [vmem:[#allocation2 + $0xd0] sm:$0xff] %vm589_vm2, %v546_v62  ;;  %v2998_v62 = vld [vmem:[%s3342_s17 + $0xda] sm:$0xff] }
  0xfa   : > { %1661 = vrot.lane.b32.xlu1 %v3621_v46, %s3306_s29  ;;  %1470 = vrot.lane.b32.xlu0 %v3379_v8, %s3305_s28 }
  0xfc   : > { %v552_v24 = vpop.permute.xlu1 %551  ;;  %v550_v25 = vpop.permute.xlu0 %549 }
  0xfd   : > { %619 = vst.msk [vmem:[#allocation2 + $0xe8] sm:$0xff] %vm589_vm2, %v552_v24  ;;  %618 = vst.msk [vmem:[#allocation2 + $0xe0] sm:$0xff] %vm589_vm2, %v550_v25  ;;  %v2967_v24 = vld [vmem:[%s3342_s17 + $0xe1] sm:$0xff] }
  0xfe   : > { %1085 = vrot.lane.b32.xlu1 %v3621_v46, %s3303_s22  ;;  %894 = vrot.lane.b32.xlu0 %v3379_v8, %s3302_s21 }
 0x100   : > { %v556_v9 = vpop.permute.xlu1 %555  ;;  %v554_v63 = vpop.permute.xlu0 %553 }
 0x101   : > { %621 = vst.msk [vmem:[#allocation2 + $0xf8] sm:$0xff] %vm589_vm2, %v556_v9  ;;  %620 = vst.msk [vmem:[#allocation2 + $0xf0] sm:$0xff] %vm589_vm2, %v554_v63 }
 0x102   : > { %1087 = vrot.lane.b32.xlu1 %v3618_v43, %s3303_s22  ;;  %1663 = vrot.lane.b32.xlu0 %v3618_v43, %s3306_s29 }
 0x104   : > { %v690_v1 = vpop.permute.xlu1 %689  ;;  %v688_v0 = vpop.permute.xlu0 %687 }
 0x105   : > { %785 = vst.msk [vmem:[#allocation2 + $0x8] sm:$0xff] %vm783_vm3, %v690_v1  ;;  %784 = vst.msk [vmem:[#allocation2] sm:$0xff] %vm783_vm3, %v688_v0  ;;  %v2905_v1 = vld [vmem:[%s3342_s17 + $0xe2] sm:$0xff] }
 0x106   : > { %1281 = vrot.lane.b32.xlu1 %v3457_v26, %s3304_s23  ;;  %1279 = vrot.lane.b32.xlu0 %v3460_v27, %s3304_s23 }
 0x108   : > { %v694_v8 = vpop.permute.xlu1 %693  ;;  %v692_v46 = vpop.permute.xlu0 %691 }
 0x109   : > { %787 = vst.msk [vmem:[#allocation2 + $0x18] sm:$0xff] %vm783_vm3, %v694_v8  ;;  %786 = vst.msk [vmem:[#allocation2 + $0x10] sm:$0xff] %vm783_vm3, %v692_v46 }
 0x10a   : > { %896 = vrot.lane.b32.xlu1 %v3392_v11, %s3302_s21  ;;  %1472 = vrot.lane.b32.xlu0 %v3392_v11, %s3305_s28 }
 0x10c   : > { %v698_v43 = vpop.permute.xlu1 %697  ;;  %v696_v2 = vpop.permute.xlu0 %695 }
 0x10d   : > { %789 = vst.msk [vmem:[#allocation2 + $0x28] sm:$0xff] %vm783_vm3, %v698_v43  ;;  %788 = vst.msk [vmem:[#allocation2 + $0x20] sm:$0xff] %vm783_vm3, %v696_v2 }
 0x10e   : > { %1665 = vrot.lane.b32.xlu1 %v3631_v48, %s3306_s29  ;;  %1474 = vrot.lane.b32.xlu0 %v3389_v10, %s3305_s28 }
 0x110   : > { %v702_v26 = vpop.permute.xlu1 %701  ;;  %v700_v27 = vpop.permute.xlu0 %699 }
 0x111   : > { %791 = vst.msk [vmem:[#allocation2 + $0x38] sm:$0xff] %vm783_vm3, %v702_v26  ;;  %790 = vst.msk [vmem:[#allocation2 + $0x30] sm:$0xff] %vm783_vm3, %v700_v27  ;;  %v2874_v26 = vld [vmem:[%s3342_s17 + $0xf1] sm:$0xff] }
 0x112   : > { %1089 = vrot.lane.b32.xlu1 %v3631_v48, %s3303_s22  ;;  %898 = vrot.lane.b32.xlu0 %v3389_v10, %s3302_s21 }
 0x114   : > { %v706_v11 = vpop.permute.xlu1 %705  ;;  %v704_v13 = vpop.permute.xlu0 %703 }
 0x115   : > { %793 = vst.msk [vmem:[#allocation2 + $0x48] sm:$0xff] %vm783_vm3, %v706_v11  ;;  %792 = vst.msk [vmem:[#allocation2 + $0x40] sm:$0xff] %vm783_vm3, %v704_v13  ;;  %v3000_v13 = vld [vmem:[%s3342_s17 + $0xf2] sm:$0xff] }
 0x116   : > { %1091 = vrot.lane.b32.xlu1 %v3628_v47, %s3303_s22  ;;  %1667 = vrot.lane.b32.xlu0 %v3628_v47, %s3306_s29 }
 0x118   : > { %v710_v17 = vpop.permute.xlu1 %709  ;;  %v708_v3 = vpop.permute.xlu0 %707 }
 0x119   : > { %795 = vst.msk [vmem:[#allocation2 + $0x58] sm:$0xff] %vm783_vm3, %v710_v17  ;;  %794 = vst.msk [vmem:[#allocation2 + $0x50] sm:$0xff] %vm783_vm3, %v708_v3  ;;  %v2969_v17 = vld [vmem:[%s3342_s17 + $0xf9] sm:$0xff] }
 0x11a   : > { %1285 = vrot.lane.b32.xlu1 %v3463_v28, %s3304_s23  ;;  %1283 = vrot.lane.b32.xlu0 %v3474_v31, %s3304_s23 }
 0x11c   : > { %v714_v10 = vpop.permute.xlu1 %713  ;;  %v712_v48 = vpop.permute.xlu0 %711 }
 0x11d   : > { %797 = vst.msk [vmem:[#allocation2 + $0x68] sm:$0xff] %vm783_vm3, %v714_v10  ;;  %796 = vst.msk [vmem:[#allocation2 + $0x60] sm:$0xff] %vm783_vm3, %v712_v48 }
 0x11e   : > { %900 = vrot.lane.b32.xlu1 %v3406_v15, %s3302_s21  ;;  %1476 = vrot.lane.b32.xlu0 %v3406_v15, %s3305_s28 }
 0x120   : > { %v718_v47 = vpop.permute.xlu1 %717  ;;  %v716_v19 = vpop.permute.xlu0 %715 }
 0x121   : > { %799 = vst.msk [vmem:[#allocation2 + $0x78] sm:$0xff] %vm783_vm3, %v718_v47  ;;  %798 = vst.msk [vmem:[#allocation2 + $0x70] sm:$0xff] %vm783_vm3, %v716_v19  ;;  %v2907_v47 = vld [vmem:[%s3342_s17 + $0xfa] sm:$0xff] }
 0x122   : > { %1669 = vrot.lane.b32.xlu1 %v3641_v50, %s3306_s29  ;;  %1478 = vrot.lane.b32.xlu0 %v3403_v14, %s3305_s28 }
 0x124   : > { %v722_v28 = vpop.permute.xlu1 %721  ;;  %v720_v31 = vpop.permute.xlu0 %719 }
 0x125   : > { %801 = vst.msk [vmem:[#allocation2 + $0x88] sm:$0xff] %vm783_vm3, %v722_v28  ;;  %800 = vst.msk [vmem:[#allocation2 + $0x80] sm:$0xff] %vm783_vm3, %v720_v31 }
 0x126   : > { %1093 = vrot.lane.b32.xlu1 %v3641_v50, %s3303_s22  ;;  %902 = vrot.lane.b32.xlu0 %v3403_v14, %s3302_s21 }
 0x128   : > { %v726_v15 = vpop.permute.xlu1 %725  ;;  %v724_v20 = vpop.permute.xlu0 %723 }
 0x129   : > { %803 = vst.msk [vmem:[#allocation2 + $0x98] sm:$0xff] %vm783_vm3, %v726_v15  ;;  %802 = vst.msk [vmem:[#allocation2 + $0x90] sm:$0xff] %vm783_vm3, %v724_v20 }
 0x12a   : > { %1095 = vrot.lane.b32.xlu1 %v3638_v49, %s3303_s22  ;;  %1671 = vrot.lane.b32.xlu0 %v3638_v49, %s3306_s29  ;;  %v2963_v49 = vld [vmem:[%s3342_s17 + $0xb1] sm:$0xff] }
 0x12c   : > { %v730_v53 = vpop.permute.xlu1 %729  ;;  %v728_v5 = vpop.permute.xlu0 %727 }
 0x12d   : > { %805 = vst.msk [vmem:[#allocation2 + $0xa8] sm:$0xff] %vm783_vm3, %v730_v53  ;;  %804 = vst.msk [vmem:[#allocation2 + $0xa0] sm:$0xff] %vm783_vm3, %v728_v5  ;;  %v2876_v53 = vld [vmem:[%s3342_s17 + $0x109] sm:$0xff] }
 0x12e   : > { %1289 = vrot.lane.b32.xlu1 %v3477_v32, %s3304_s23  ;;  %1287 = vrot.lane.b32.xlu0 %v3480_v33, %s3304_s23 }
 0x130   : > { %v734_v14 = vpop.permute.xlu1 %733  ;;  %v732_v50 = vpop.permute.xlu0 %731 }
 0x131   : > { %807 = vst.msk [vmem:[#allocation2 + $0xb8] sm:$0xff] %vm783_vm3, %v734_v14  ;;  %806 = vst.msk [vmem:[#allocation2 + $0xb0] sm:$0xff] %vm783_vm3, %v732_v50  ;;  %v3002_v50 = vld [vmem:[%s3342_s17 + $0x10a] sm:$0xff] }
 0x132   : > { %904 = vrot.lane.b32.xlu1 %v3430_v21, %s3302_s21  ;;  %1480 = vrot.lane.b32.xlu0 %v3430_v21, %s3305_s28 }
 0x134   : > { %v883_v55 = vpop.permute.xlu1 %882  ;;  %v881_v56 = vpop.permute.xlu0 %880 }
 0x135   : > { %978 = vst.msk [vmem:[#allocation2 + $0x8] sm:$0xff] %vm976_vm4, %v883_v55  ;;  %977 = vst.msk [vmem:[#allocation2] sm:$0xff] %vm976_vm4, %v881_v56 }
 0x136   : > { %1673 = vrot.lane.b32.xlu1 %v3651_v52, %s3306_s29  ;;  %1482 = vrot.lane.b32.xlu0 %v2963_v49, %s3305_s28 }
 0x138   : > { %v1076_v32 = vpop.permute.xlu1 %1075  ;;  %v1074_v33 = vpop.permute.xlu0 %1073 }
 0x139   : > { %1171 = vst.msk [vmem:[#allocation2 + $0x8] sm:$0xff] %vm1169_vm5, %v1076_v32  ;;  %1170 = vst.msk [vmem:[#allocation2] sm:$0xff] %vm1169_vm5, %v1074_v33  ;;  %v2909_v33 = vld [vmem:[%s3342_s17 + $0x112] sm:$0xff] }
 0x13a   : > { %1097 = vrot.lane.b32.xlu1 %v3651_v52, %s3303_s22  ;;  %906 = vrot.lane.b32.xlu0 %v2963_v49, %s3302_s21  ;;  %v2971_v49 = vld [vmem:[%s3342_s17 + $0x111] sm:$0xff] }
 0x13c   : > { %v1270_v21 = vpop.permute.xlu1 %1269  ;;  %v1268_v12 = vpop.permute.xlu0 %1267 }
 0x13d   : > { %1365 = vst.msk [vmem:[#allocation2 + $0x8] sm:$0xff] %vm1363_vm6, %v1270_v21  ;;  %1364 = vst.msk [vmem:[#allocation2] sm:$0xff] %vm1363_vm6, %v1268_v12 }
 0x13e   : > { %1099 = vrot.lane.b32.xlu1 %v3648_v51, %s3303_s22  ;;  %1675 = vrot.lane.b32.xlu0 %v3648_v51, %s3306_s29  ;;  %v2965_v51 = vld [vmem:[%s3342_s17 + $0xc9] sm:$0xff] }
 0x140   : > { %v885_v16 = vpop.permute.xlu1 %884  ;;  %v1461_v52 = vpop.permute.xlu0 %1460 }
 0x141   : > { %979 = vst.msk [vmem:[#allocation2 + $0x10] sm:$0xff] %vm976_vm4, %v885_v16 }
 0x142   : > { %1557 = vst.msk [vmem:[#allocation2] sm:$0xff] %vm1556_vm7, %v1461_v52  ;;  %1293 = vrot.lane.b32.xlu1 %v3492_v34, %s3304_s23  ;;  %1291 = vrot.lane.b32.xlu0 %v3495_v35, %s3304_s23 }
 0x144   : > { %v1654_v4 = vpop.permute.xlu1 %1653  ;;  %v1463_v29 = vpop.permute.xlu0 %1462 }
 0x145   : > { %1750 = vst.msk [vmem:[#allocation2] sm:$0xff] %vm1749_vm8, %v1654_v4  ;;  %v2878_v4 = vld [vmem:[%s3342_s17 + $0x121] sm:$0xff] }
 0x146   : > { %1558 = vst.msk [vmem:[#allocation2 + $0x8] sm:$0xff] %vm1556_vm7, %v1463_v29  ;;  %908 = vrot.lane.b32.xlu1 %v2870_v57, %s3302_s21  ;;  %1484 = vrot.lane.b32.xlu0 %v2870_v57, %s3305_s28 }
 0x148   : > { %v1078_v18 = vpop.permute.xlu1 %1077  ;;  %v887_v58 = vpop.permute.xlu0 %886 }
 0x149   : > { %1172 = vst.msk [vmem:[#allocation2 + $0x10] sm:$0xff] %vm1169_vm5, %v1078_v18  ;;  %v3004_v18 = vld [vmem:[%s3342_s17 + $0x122] sm:$0xff] }
 0x14a   : > { %980 = vst.msk [vmem:[#allocation2 + $0x18] sm:$0xff] %vm976_vm4, %v887_v58  ;;  %1677 = vrot.lane.b32.xlu1 %v3659_v54, %s3306_s29  ;;  %1486 = vrot.lane.b32.xlu0 %v2965_v51, %s3305_s28  ;;  %v2973_v58 = vld [vmem:[%s3342_s17 + $0x129] sm:$0xff] }
 0x14c   : > { %v1080_v34 = vpop.permute.xlu1 %1079  ;;  %v1656_v35 = vpop.permute.xlu0 %1655  ;;  %v3987_v22 = vld [vmem:[#allocation2] sm:$0xff] }
 0x14d   : > { %1173 = vst.msk [vmem:[#allocation2 + $0x18] sm:$0xff] %vm1169_vm5, %v1080_v34  ;;  %3163 = vmatprep.mubr.msk.f32.mxu0 %vm1828_vm9, %v3987_v22 }
 0x14e   : > { %1751 = vst.msk [vmem:[#allocation2 + $0x8] sm:$0xff] %vm1749_vm8, %v1656_v35  ;;  %1101 = vrot.lane.b32.xlu1 %v3659_v54, %s3303_s22  ;;  %910 = vrot.lane.b32.xlu0 %v2965_v51, %s3302_s21  ;;  %v2872_v54 = vld [vmem:[%s3342_s17 + $0xd9] sm:$0xff] }
 0x150   : > { %v1274_v7 = vpop.permute.xlu1 %1273  ;;  %v1272_v59 = vpop.permute.xlu0 %1271 }
 0x151   : > { %1367 = vst.msk [vmem:[#allocation2 + $0x18] sm:$0xff] %vm1363_vm6, %v1274_v7  ;;  %1366 = vst.msk [vmem:[#allocation2 + $0x10] sm:$0xff] %vm1363_vm6, %v1272_v59  ;;  %v2911_v7 = vld [vmem:[%s3342_s17 + $0x12a] sm:$0xff] }
 0x152   : > { %1103 = vrot.lane.b32.xlu1 %v2903_v23, %s3303_s22  ;;  %1679 = vrot.lane.b32.xlu0 %v2903_v23, %s3306_s29 }
 0x154   : > { %v889_v60 = vpop.permute.xlu1 %888  ;;  %v1465_v61 = vpop.permute.xlu0 %1464 }
 0x155   : > { %v4001_v6 = vld [vmem:[#allocation2 + $0x8] sm:$0xff]  ;;  %981 = vst.msk [vmem:[#allocation2 + $0x20] sm:$0xff] %vm976_vm4, %v889_v60 }
 0x156   : > { %1559 = vst.msk [vmem:[#allocation2 + $0x10] sm:$0xff] %vm1556_vm7, %v1465_v61  ;;  %3164 = vmatmul.mubr.msk.f32.vlgmr.msra.gmra.mrb[0].mxu0 %vm1828_vm9, %v4001_v6  ;;  %1297 = vrot.lane.b32.xlu1 %v3502_v36, %s3304_s23  ;;  %v2848_v61 = vld [vmem:[%s3342_s17 + $0x138] sm:$0xff] }
 0x157   : > { %1295 = vrot.lane.b32.xlu0 %v3505_v37, %s3304_s23 }
 0x158   : > { %v1658_v42 = vpop.permute.xlu1 %1657  ;;  %v1467_v30 = vpop.permute.xlu0 %1466 }
 0x159   : > { %1752 = vst.msk [vmem:[#allocation2 + $0x10] sm:$0xff] %vm1749_vm8, %v1658_v42 }
 0x15a   : > { %1560 = vst.msk [vmem:[#allocation2 + $0x18] sm:$0xff] %vm1556_vm7, %v1467_v30  ;;  %912 = vrot.lane.b32.xlu1 %v2872_v54, %s3302_s21 }
 0x15b   : > { %1488 = vrot.lane.b32.xlu0 %v2872_v54, %s3305_s28 }
 0x15c   : > { %v1082_v25 = vpop.permute.xlu1 %1081  ;;  %v891_v9 = vpop.permute.xlu0 %890 }
 0x15d   : > { %1174 = vst.msk [vmem:[#allocation2 + $0x20] sm:$0xff] %vm1169_vm5, %v1082_v25 }
 0x15e   : > { %982 = vst.msk [vmem:[#allocation2 + $0x28] sm:$0xff] %vm976_vm4, %v891_v9  ;;  %1681 = vrot.lane.b32.xlu1 %v2998_v62, %s3306_s29 }
 0x15f   : > { %1490 = vrot.lane.b32.xlu0 %v2967_v24, %s3305_s28 }
 0x160   : > { %v1084_v36 = vpop.permute.xlu1 %1083  ;;  %v1660_v37 = vpop.permute.xlu0 %1659  ;;  %v4022_v63 = vld [vmem:[#allocation2 + $0x10] sm:$0xff] }
 0x161   : > { %1175 = vst.msk [vmem:[#allocation2 + $0x28] sm:$0xff] %vm1169_vm5, %v1084_v36  ;;  %3166 = vmatprep.mubr.msk.f32.mxu0 %vm1828_vm9, %v4022_v63 }
 0x162   : > { %1753 = vst.msk [vmem:[#allocation2 + $0x18] sm:$0xff] %vm1749_vm8, %v1660_v37  ;;  %1105 = vrot.lane.b32.xlu1 %v2998_v62, %s3303_s22  ;;  %v2974_v62 = vld [vmem:[%s3342_s17 + $0x139] sm:$0xff] }
 0x163   : > { %914 = vrot.lane.b32.xlu0 %v2967_v24, %s3302_s21  ;;  %v2943_v24 = vld [vmem:[%s3342_s17 + $0x140] sm:$0xff] }
 0x164   : > { %v1278_v0 = vpop.permute.xlu1 %1277  ;;  %v1276_v8 = vpop.permute.xlu0 %1275 }
 0x165   : > { %1369 = vst.msk [vmem:[#allocation2 + $0x28] sm:$0xff] %vm1363_vm6, %v1278_v0  ;;  %1368 = vst.msk [vmem:[#allocation2 + $0x20] sm:$0xff] %vm1363_vm6, %v1276_v8  ;;  %v2975_v0 = vld [vmem:[%s3342_s17 + $0x141] sm:$0xff] }
 0x166   : > { %1107 = vrot.lane.b32.xlu1 %v2905_v1, %s3303_s22 }
 0x167   : > { %1683 = vrot.lane.b32.xlu0 %v2905_v1, %s3306_s29  ;;  %v3006_v1 = vld [vmem:[%s3342_s17 + $0x13a] sm:$0xff] }
 0x168   : > { %v893_v46 = vpop.permute.xlu1 %892  ;;  %v1469_v43 = vpop.permute.xlu0 %1468 }
 0x169   : > { %v4035_v2 = vld [vmem:[#allocation2 + $0x18] sm:$0xff]  ;;  %983 = vst.msk [vmem:[#allocation2 + $0x30] sm:$0xff] %vm976_vm4, %v893_v46 }
 0x16a   : > { %1561 = vst.msk [vmem:[#allocation2 + $0x20] sm:$0xff] %vm1556_vm7, %v1469_v43  ;;  %3167 = vmatmul.mubr.msk.f32.gmra.mrb[2].mxu0 %vm1828_vm9, %v4035_v2  ;;  %1301 = vrot.lane.b32.xlu1 %v3508_v38, %s3304_s23 }
 0x16b   : > { %1299 = vrot.lane.b32.xlu0 %v3517_v39, %s3304_s23 }
 0x16c   : > { %v1662_v27 = vpop.permute.xlu1 %1661  ;;  %v1471_v11 = vpop.permute.xlu0 %1470 }
 0x16d   : > { %1754 = vst.msk [vmem:[#allocation2 + $0x20] sm:$0xff] %vm1749_vm8, %v1662_v27 }
 0x16e   : > { %1562 = vst.msk [vmem:[#allocation2 + $0x28] sm:$0xff] %vm1556_vm7, %v1471_v11  ;;  %916 = vrot.lane.b32.xlu1 %v2874_v26, %s3302_s21  ;;  %v2913_v11 = vld [vmem:[%s3342_s17 + $0x142] sm:$0xff] }
 0x16f   : > { %1492 = vrot.lane.b32.xlu0 %v2874_v26, %s3305_s28 }
 0x170   : > { %v1086_v3 = vpop.permute.xlu1 %1085  ;;  %v895_v10 = vpop.permute.xlu0 %894 }
 0x171   : > { %1176 = vst.msk [vmem:[#allocation2 + $0x30] sm:$0xff] %vm1169_vm5, %v1086_v3 }
 0x172   : > { %984 = vst.msk [vmem:[#allocation2 + $0x38] sm:$0xff] %vm976_vm4, %v895_v10  ;;  %1685 = vrot.lane.b32.xlu1 %v3000_v13, %s3306_s29  ;;  %v2850_v10 = vld [vmem:[%s3342_s17 + $0x150] sm:$0xff] }
 0x173   : > { %1494 = vrot.lane.b32.xlu0 %v2969_v17, %s3305_s28 }
 0x174   : > { %v1088_v38 = vpop.permute.xlu1 %1087  ;;  %v1664_v39 = vpop.permute.xlu0 %1663  ;;  %v4056_v48 = vld [vmem:[#allocation2 + $0x20] sm:$0xff] }
 0x175   : > { %1177 = vst.msk [vmem:[#allocation2 + $0x38] sm:$0xff] %vm1169_vm5, %v1088_v38  ;;  %3169 = vmatprep.mubr.msk.f32.mxu0 %vm1828_vm9, %v4056_v48 }
 0x176   : > { %1755 = vst.msk [vmem:[#allocation2 + $0x28] sm:$0xff] %vm1749_vm8, %v1664_v39  ;;  %1109 = vrot.lane.b32.xlu1 %v3000_v13, %s3303_s22 }
 0x177   : > { %918 = vrot.lane.b32.xlu0 %v2969_v17, %s3302_s21 }
 0x178   : > { %v1282_v19 = vpop.permute.xlu1 %1281  ;;  %v1280_v28 = vpop.permute.xlu0 %1279 }
 0x179   : > { %1371 = vst.msk [vmem:[#allocation2 + $0x38] sm:$0xff] %vm1363_vm6, %v1282_v19  ;;  %1370 = vst.msk [vmem:[#allocation2 + $0x30] sm:$0xff] %vm1363_vm6, %v1280_v28  ;;  %v2945_v19 = vld [vmem:[%s3342_s17 + $0x158] sm:$0xff] }
 0x17a   : > { %1111 = vrot.lane.b32.xlu1 %v2907_v47, %s3303_s22 }
 0x17b   : > { %1687 = vrot.lane.b32.xlu0 %v2907_v47, %s3306_s29  ;;  %v2976_v47 = vld [vmem:[%s3342_s17 + $0x151] sm:$0xff] }
 0x17c   : > { %v897_v31 = vpop.permute.xlu1 %896  ;;  %v1473_v15 = vpop.permute.xlu0 %1472 }
 0x17d   : > { %v4069_v20 = vld [vmem:[#allocation2 + $0x28] sm:$0xff]  ;;  %985 = vst.msk [vmem:[#allocation2 + $0x40] sm:$0xff] %vm976_vm4, %v897_v31 }
 0x17e   : > { %1563 = vst.msk [vmem:[#allocation2 + $0x30] sm:$0xff] %vm1556_vm7, %v1473_v15  ;;  %3170 = vmatmul.mubr.msk.f32.gmra.mrb[4].mxu0 %vm1828_vm9, %v4069_v20  ;;  %1305 = vrot.lane.b32.xlu1 %v3520_v40, %s3304_s23 }
 0x17f   : > { %1303 = vrot.lane.b32.xlu0 %v3523_v41, %s3304_s23 }
 0x180   : > { %v1666_v5 = vpop.permute.xlu1 %1665  ;;  %v1475_v14 = vpop.permute.xlu0 %1474 }
 0x181   : > { %1756 = vst.msk [vmem:[#allocation2 + $0x30] sm:$0xff] %vm1749_vm8, %v1666_v5 }
 0x182   : > { %1564 = vst.msk [vmem:[#allocation2 + $0x38] sm:$0xff] %vm1556_vm7, %v1475_v14  ;;  %920 = vrot.lane.b32.xlu1 %v2876_v53, %s3302_s21  ;;  %v3008_v14 = vld [vmem:[%s3342_s17 + $0x152] sm:$0xff] }
 0x183   : > { %1496 = vrot.lane.b32.xlu0 %v2876_v53, %s3305_s28 }
 0x184   : > { %v1090_v55 = vpop.permute.xlu1 %1089  ;;  %v899_v56 = vpop.permute.xlu0 %898 }
 0x185   : > { %1178 = vst.msk [vmem:[#allocation2 + $0x40] sm:$0xff] %vm1169_vm5, %v1090_v55 }
 0x186   : > { %986 = vst.msk [vmem:[#allocation2 + $0x48] sm:$0xff] %vm976_vm4, %v899_v56  ;;  %1689 = vrot.lane.b32.xlu1 %v3002_v50, %s3306_s29 }
 0x187   : > { %1498 = vrot.lane.b32.xlu0 %v2971_v49, %s3305_s28 }
 0x188   : > { %v1092_v40 = vpop.permute.xlu1 %1091  ;;  %v1668_v41 = vpop.permute.xlu0 %1667  ;;  %v4090_v32 = vld [vmem:[#allocation2 + $0x30] sm:$0xff] }
 0x189   : > { %1179 = vst.msk [vmem:[#allocation2 + $0x48] sm:$0xff] %vm1169_vm5, %v1092_v40  ;;  %3172 = vmatprep.mubr.msk.f32.mxu0 %vm1828_vm9, %v4090_v32 }
 0x18a   : > { %1757 = vst.msk [vmem:[#allocation2 + $0x38] sm:$0xff] %vm1749_vm8, %v1668_v41  ;;  %1113 = vrot.lane.b32.xlu1 %v3002_v50, %s3303_s22  ;;  %v2977_v50 = vld [vmem:[%s3342_s17 + $0x159] sm:$0xff] }
 0x18b   : > { %922 = vrot.lane.b32.xlu0 %v2971_v49, %s3302_s21 }
 0x18c   : > { %v1286_v21 = vpop.permute.xlu1 %1285  ;;  %v1284_v12 = vpop.permute.xlu0 %1283 }
 0x18d   : > { %1373 = vst.msk [vmem:[#allocation2 + $0x48] sm:$0xff] %vm1363_vm6, %v1286_v21  ;;  %1372 = vst.msk [vmem:[#allocation2 + $0x40] sm:$0xff] %vm1363_vm6, %v1284_v12 }
 0x18e   : > { %1115 = vrot.lane.b32.xlu1 %v2909_v33, %s3303_s22 }
 0x18f   : > { %1691 = vrot.lane.b32.xlu0 %v2909_v33, %s3306_s29  ;;  %v2915_v33 = vld [vmem:[%s3342_s17 + $0x15a] sm:$0xff] }
 0x190   : > { %v901_v16 = vpop.permute.xlu1 %900  ;;  %v1477_v52 = vpop.permute.xlu0 %1476 }
 0x191   : > { %v4103_v57 = vld [vmem:[#allocation2 + $0x38] sm:$0xff]  ;;  %987 = vst.msk [vmem:[#allocation2 + $0x50] sm:$0xff] %vm976_vm4, %v901_v16  ;;  %v2852_v16 = vld [vmem:[%s3342_s17 + $0x168] sm:$0xff] }
 0x192   : > { %1565 = vst.msk [vmem:[#allocation2 + $0x40] sm:$0xff] %vm1556_vm7, %v1477_v52  ;;  %3173 = vmatmul.mubr.msk.f32.gmra.mrb[6].mxu0 %vm1828_vm9, %v4103_v57  ;;  %1309 = vrot.lane.b32.xlu1 %v3539_v45, %s3304_s23 }
 0x193   : > { %1307 = vrot.lane.b32.xlu0 %v3536_v44, %s3304_s23 }
 0x194   : > { %v1670_v29 = vpop.permute.xlu1 %1669  ;;  %v1479_v51 = vpop.permute.xlu0 %1478 }
 0x195   : > { %1758 = vst.msk [vmem:[#allocation2 + $0x40] sm:$0xff] %vm1749_vm8, %v1670_v29  ;;  %v2978_v29 = vld [vmem:[%s3342_s17 + $0x169] sm:$0xff] }
 0x196   : > { %1566 = vst.msk [vmem:[#allocation2 + $0x48] sm:$0xff] %vm1556_vm7, %v1479_v51  ;;  %924 = vrot.lane.b32.xlu1 %v2878_v4, %s3302_s21  ;;  %v2947_v51 = vld [vmem:[%s3342_s17 + $0x170] sm:$0xff] }
 0x197   : > { %1500 = vrot.lane.b32.xlu0 %v2878_v4, %s3305_s28 }
 0x198   : > { %v1094_v34 = vpop.permute.xlu1 %1093  ;;  %v903_v35 = vpop.permute.xlu0 %902 }
 0x199   : > { %1180 = vst.msk [vmem:[#allocation2 + $0x50] sm:$0xff] %vm1169_vm5, %v1094_v34 }
 0x19a   : > { %988 = vst.msk [vmem:[#allocation2 + $0x58] sm:$0xff] %vm976_vm4, %v903_v35  ;;  %1693 = vrot.lane.b32.xlu1 %v3004_v18, %s3306_s29 }
 0x19b   : > { %1502 = vrot.lane.b32.xlu0 %v2973_v58, %s3305_s28 }
 0x19c   : > { %v1096_v44 = vpop.permute.xlu1 %1095  ;;  %v1672_v45 = vpop.permute.xlu0 %1671  ;;  %v4124_v23 = vld [vmem:[#allocation2 + $0x40] sm:$0xff] }
 0x19d   : > { %1181 = vst.msk [vmem:[#allocation2 + $0x58] sm:$0xff] %vm1169_vm5, %v1096_v44  ;;  %3175 = vmatprep.mubr.msk.f32.mxu0 %vm1828_vm9, %v4124_v23 }
 0x19e   : > { %1759 = vst.msk [vmem:[#allocation2 + $0x48] sm:$0xff] %vm1749_vm8, %v1672_v45  ;;  %1117 = vrot.lane.b32.xlu1 %v3004_v18, %s3303_s22  ;;  %v3010_v45 = vld [vmem:[%s3342_s17 + $0x16a] sm:$0xff] }
 0x19f   : > { %926 = vrot.lane.b32.xlu0 %v2973_v58, %s3302_s21 }
 0x1a0   : > { %v1290_v59 = vpop.permute.xlu1 %1289  ;;  %v1288_v60 = vpop.permute.xlu0 %1287 }
 0x1a1   : > { %1375 = vst.msk [vmem:[#allocation2 + $0x58] sm:$0xff] %vm1363_vm6, %v1290_v59  ;;  %1374 = vst.msk [vmem:[#allocation2 + $0x50] sm:$0xff] %vm1363_vm6, %v1288_v60 }
 0x1a2   : > { %1119 = vrot.lane.b32.xlu1 %v2911_v7, %s3303_s22 }
 0x1a3   : > { %1695 = vrot.lane.b32.xlu0 %v2911_v7, %s3306_s29  ;;  %v2979_v7 = vld [vmem:[%s3342_s17 + $0x171] sm:$0xff] }
 0x1a4   : > { %v905_v54 = vpop.permute.xlu1 %904  ;;  %v1481_v42 = vpop.permute.xlu0 %1480 }
 0x1a5   : > { %v4138_v30 = vld [vmem:[#allocation2 + $0x48] sm:$0xff]  ;;  %989 = vst.msk [vmem:[#allocation2 + $0x60] sm:$0xff] %vm976_vm4, %v905_v54 }
 0x1a6   : > { %1567 = vst.msk [vmem:[#allocation2 + $0x50] sm:$0xff] %vm1556_vm7, %v1481_v42  ;;  %3176 = vmatmul.mubr.msk.f32.gmra.mrb[8].mxu0 %vm1828_vm9, %v4138_v30  ;;  %735 = vrot.lane.b32.xlu1 %v2848_v61, %s3301_s20 }
 0x1a7   : > { %1311 = vrot.lane.b32.xlu0 %v2848_v61, %s3304_s23 }
 0x1a8   : > { %v1674_v25 = vpop.permute.xlu1 %1673  ;;  %v1483_v9 = vpop.permute.xlu0 %1482 }
 0x1a9   : > { %1760 = vst.msk [vmem:[#allocation2 + $0x50] sm:$0xff] %vm1749_vm8, %v1674_v25 }
 0x1aa   : > { %1568 = vst.msk [vmem:[#allocation2 + $0x58] sm:$0xff] %vm1556_vm7, %v1483_v9  ;;  %1504 = vrot.lane.b32.xlu1 %v2974_v62, %s3305_s28  ;;  %v2854_v9 = vld [vmem:[%s3342_s17 + $0x180] sm:$0xff] }
 0x1ab   : > { %1313 = vrot.lane.b32.xlu0 %v2943_v24, %s3304_s23 }
 0x1ac   : > { %v1098_v36 = vpop.permute.xlu1 %1097  ;;  %v907_v37 = vpop.permute.xlu0 %906 }
 0x1ad   : > { %1182 = vst.msk [vmem:[#allocation2 + $0x60] sm:$0xff] %vm1169_vm5, %v1098_v36 }
 0x1ae   : > { %990 = vst.msk [vmem:[#allocation2 + $0x68] sm:$0xff] %vm976_vm4, %v907_v37  ;;  %928 = vrot.lane.b32.xlu1 %v2974_v62, %s3302_s21  ;;  %v2917_v62 = vld [vmem:[%s3342_s17 + $0x172] sm:$0xff] }
 0x1af   : > { %737 = vrot.lane.b32.xlu0 %v2943_v24, %s3301_s20 }
 0x1b0   : > { %v1100_v8 = vpop.permute.xlu1 %1099  ;;  %v1676_v46 = vpop.permute.xlu0 %1675  ;;  %v4158_v43 = vld [vmem:[#allocation2 + $0x50] sm:$0xff] }
 0x1b1   : > { %1183 = vst.msk [vmem:[#allocation2 + $0x68] sm:$0xff] %vm1169_vm5, %v1100_v8  ;;  %3178 = vmatprep.mubr.msk.f32.mxu0 %vm1828_vm9, %v4158_v43  ;;  %v2949_v8 = vld [vmem:[%s3342_s17 + $0x188] sm:$0xff] }
 0x1b2   : > { %1761 = vst.msk [vmem:[#allocation2 + $0x58] sm:$0xff] %vm1749_vm8, %v1676_v46  ;;  %1697 = vrot.lane.b32.xlu1 %v3006_v1, %s3306_s29 }
 0x1b3   : > { %1506 = vrot.lane.b32.xlu0 %v2975_v0, %s3305_s28 }
 0x1b4   : > { %v1294_v26 = vpop.permute.xlu1 %1293  ;;  %v1292_v27 = vpop.permute.xlu0 %1291 }
 0x1b5   : > { %1377 = vst.msk [vmem:[#allocation2 + $0x68] sm:$0xff] %vm1363_vm6, %v1294_v26  ;;  %1376 = vst.msk [vmem:[#allocation2 + $0x60] sm:$0xff] %vm1363_vm6, %v1292_v27 }
 0x1b6   : > { %1121 = vrot.lane.b32.xlu1 %v3006_v1, %s3303_s22 }
 0x1b7   : > { %930 = vrot.lane.b32.xlu0 %v2975_v0, %s3302_s21  ;;  %v2980_v0 = vld [vmem:[%s3342_s17 + $0x181] sm:$0xff] }
 0x1b8   : > { %v909_v13 = vpop.permute.xlu1 %908  ;;  %v1485_v17 = vpop.permute.xlu0 %1484 }
 0x1b9   : > { %v4171_v3 = vld [vmem:[#allocation2 + $0x58] sm:$0xff]  ;;  %991 = vst.msk [vmem:[#allocation2 + $0x70] sm:$0xff] %vm976_vm4, %v909_v13 }
 0x1ba   : > { %1569 = vst.msk [vmem:[#allocation2 + $0x60] sm:$0xff] %vm1556_vm7, %v1485_v17  ;;  %3179 = vmatmul.mubr.msk.f32.gmra.mrb[10].mxu0 %vm1828_vm9, %v4171_v3  ;;  %1123 = vrot.lane.b32.xlu1 %v2913_v11, %s3303_s22  ;;  %v3012_v17 = vld [vmem:[%s3342_s17 + $0x182] sm:$0xff] }
 0x1bb   : > { %1699 = vrot.lane.b32.xlu0 %v2913_v11, %s3306_s29 }
 0x1bc   : > { %v1678_v38 = vpop.permute.xlu1 %1677  ;;  %v1487_v39 = vpop.permute.xlu0 %1486 }
 0x1bd   : > { %1762 = vst.msk [vmem:[#allocation2 + $0x60] sm:$0xff] %vm1749_vm8, %v1678_v38 }
 0x1be   : > { %1570 = vst.msk [vmem:[#allocation2 + $0x68] sm:$0xff] %vm1556_vm7, %v1487_v39  ;;  %739 = vrot.lane.b32.xlu1 %v2850_v10, %s3301_s20 }
 0x1bf   : > { %1315 = vrot.lane.b32.xlu0 %v2850_v10, %s3304_s23  ;;  %v2981_v10 = vld [vmem:[%s3342_s17 + $0x189] sm:$0xff] }
 0x1c0   : > { %v1102_v28 = vpop.permute.xlu1 %1101  ;;  %v911_v31 = vpop.permute.xlu0 %910 }
 0x1c1   : > { %1184 = vst.msk [vmem:[#allocation2 + $0x70] sm:$0xff] %vm1169_vm5, %v1102_v28  ;;  %v3016_v28 = vld [vmem:[%s4725_s1 + $0x18] sm:$0xff] }
 0x1c2   : > { %992 = vst.msk [vmem:[#allocation2 + $0x78] sm:$0xff] %vm976_vm4, %v911_v31  ;;  %1508 = vrot.lane.b32.xlu1 %v2976_v47, %s3305_s28  ;;  %v3017_v31 = vld [vmem:[%s4725_s1 + $0x20] sm:$0xff] }
 0x1c3   : > { %1317 = vrot.lane.b32.xlu0 %v2945_v19, %s3304_s23 }
 0x1c4   : > { %v1104_v15 = vpop.permute.xlu1 %1103  ;;  %v1680_v53 = vpop.permute.xlu0 %1679  ;;  %v4190_v5 = vld [vmem:[#allocation2 + $0x60] sm:$0xff] }
 0x1c5   : > { %1185 = vst.msk [vmem:[#allocation2 + $0x78] sm:$0xff] %vm1169_vm5, %v1104_v15  ;;  %3181 = vmatprep.mubr.msk.f32.mxu0 %vm1828_vm9, %v4190_v5  ;;  %v2919_v15 = vld [vmem:[%s3342_s17 + $0x18a] sm:$0xff] }
 0x1c6   : > { %1763 = vst.msk [vmem:[#allocation2 + $0x68] sm:$0xff] %vm1749_vm8, %v1680_v53  ;;  %932 = vrot.lane.b32.xlu1 %v2976_v47, %s3302_s21  ;;  %v3269_v53 = vpack.c.bf16 %v3017_v31, %v3016_v28 }
 0x1c7   : > { %741 = vrot.lane.b32.xlu0 %v2945_v19, %s3301_s20 }
 0x1c8   : > { %v1298_v49 = vpop.permute.xlu1 %1297  ;;  %3270 = vmatprep.subr.bf16.mxu1 %v3269_v53 }
 0x1c9   : > { %v1296_v55 = vpop.permute.xlu0 %1295  ;;  %1379 = vst.msk [vmem:[#allocation2 + $0x78] sm:$0xff] %vm1363_vm6, %v1298_v49  ;;  %3272 = vmatpush3.bf16.msra.mxu1 %v3269_v53 }
 0x1ca   : > { %1378 = vst.msk [vmem:[#allocation2 + $0x70] sm:$0xff] %vm1363_vm6, %v1296_v55  ;;  %1701 = vrot.lane.b32.xlu1 %v3008_v14, %s3306_s29  ;;  %v3018_v55 = vld [vmem:[%s4725_s1 + $0x28] sm:$0xff] }
 0x1cb   : > { %1510 = vrot.lane.b32.xlu0 %v2977_v50, %s3305_s28  ;;  %3215 = vmatprep.subr.mxu1 %v3018_v55 }
 0x1cc   : > { %v913_v56 = vpop.permute.xlu1 %912 }
 0x1cd   : > { %v1489_v40 = vpop.permute.xlu0 %1488  ;;  %v4204_v41 = vld [vmem:[#allocation2 + $0x68] sm:$0xff]  ;;  %993 = vst.msk [vmem:[#allocation2 + $0x80] sm:$0xff] %vm976_vm4, %v913_v56  ;;  %v2951_v56 = vld [vmem:[%s3342_s17 + $0x1a0] sm:$0xff]  ;;  %3216 = vmatpush3.msra.mxu1 %v3018_v55 }
 0x1ce   : > { %1571 = vst.msk [vmem:[#allocation2 + $0x70] sm:$0xff] %vm1556_vm7, %v1489_v40  ;;  %3182 = vmatmul.mubr.msk.f32.gmra.mrb[12].mxu0 %vm1828_vm9, %v4204_v41  ;;  %1125 = vrot.lane.b32.xlu1 %v3008_v14, %s3303_s22  ;;  %v2950_v40 = vld [vmem:[%s3342_s17 + $0x198] sm:$0xff] }
 0x1cf   : > { %934 = vrot.lane.b32.xlu0 %v2977_v50, %s3302_s21 }
 0x1d0   : > { %v1682_v21 = vpop.permute.xlu1 %1681 }
 0x1d1   : > { %v1491_v12 = vpop.permute.xlu0 %1490  ;;  %1764 = vst.msk [vmem:[#allocation2 + $0x70] sm:$0xff] %vm1749_vm8, %v1682_v21 }
 0x1d2   : > { %1572 = vst.msk [vmem:[#allocation2 + $0x78] sm:$0xff] %vm1556_vm7, %v1491_v12  ;;  %1127 = vrot.lane.b32.xlu1 %v2915_v33, %s3303_s22  ;;  %v2983_v12 = vld [vmem:[%s3342_s17 + $0x1a1] sm:$0xff] }
 0x1d3   : > { %1703 = vrot.lane.b32.xlu0 %v2915_v33, %s3306_s29 }
 0x1d4   : > { %v1106_v52 = vpop.permute.xlu1 %1105 }
 0x1d5   : > { %v915_v4 = vpop.permute.xlu0 %914  ;;  %1186 = vst.msk [vmem:[#allocation2 + $0x80] sm:$0xff] %vm1169_vm5, %v1106_v52 }
 0x1d6   : > { %994 = vst.msk [vmem:[#allocation2 + $0x88] sm:$0xff] %vm976_vm4, %v915_v4  ;;  %743 = vrot.lane.b32.xlu1 %v2852_v16, %s3301_s20 }
 0x1d7   : > { %1319 = vrot.lane.b32.xlu0 %v2852_v16, %s3304_s23  ;;  %v2982_v16 = vld [vmem:[%s3342_s17 + $0x199] sm:$0xff] }
 0x1d8   : > { %v1108_v18 = vpop.permute.xlu1 %1107  ;;  %v4224_v34 = vld [vmem:[#allocation2 + $0x70] sm:$0xff] }
 0x1d9   : > { %v1684_v58 = vpop.permute.xlu0 %1683  ;;  %1187 = vst.msk [vmem:[#allocation2 + $0x88] sm:$0xff] %vm1169_vm5, %v1108_v18  ;;  %3184 = vmatprep.mubr.msk.f32.mxu0 %vm1828_vm9, %v4224_v34  ;;  %v3014_v18 = vld [vmem:[%s3342_s17 + $0x19a] sm:$0xff] }
 0x1da   : > { %1765 = vst.msk [vmem:[#allocation2 + $0x78] sm:$0xff] %vm1749_vm8, %v1684_v58  ;;  %1512 = vrot.lane.b32.xlu1 %v2978_v29, %s3305_s28 }
 0x1db   : > { %1321 = vrot.lane.b32.xlu0 %v2947_v51, %s3304_s23 }
 0x1dc   : > { %v1302_v35 = vpop.permute.xlu1 %1301 }
 0x1dd   : > { %v1300_v44 = vpop.permute.xlu0 %1299  ;;  %1381 = vst.msk [vmem:[#allocation2 + $0x88] sm:$0xff] %vm1363_vm6, %v1302_v35 }
 0x1de   : > { %1380 = vst.msk [vmem:[#allocation2 + $0x80] sm:$0xff] %vm1363_vm6, %v1300_v44  ;;  %936 = vrot.lane.b32.xlu1 %v2978_v29, %s3302_s21 }
 0x1df   : > { %745 = vrot.lane.b32.xlu0 %v2947_v51, %s3301_s20  ;;  %v3015_v51 = vld [vmem:[%s3342_s17 + $0x1a2] sm:$0xff] }
 0x1e0   : > { %v917_v59 = vpop.permute.xlu1 %916 }
 0x1e1   : > { %v1493_v60 = vpop.permute.xlu0 %1492  ;;  %v4238_v61 = vld [vmem:[#allocation2 + $0x78] sm:$0xff]  ;;  %995 = vst.msk [vmem:[#allocation2 + $0x90] sm:$0xff] %vm976_vm4, %v917_v59 }
 0x1e2   : > { %1573 = vst.msk [vmem:[#allocation2 + $0x80] sm:$0xff] %vm1556_vm7, %v1493_v60  ;;  %3185 = vmatmul.mubr.msk.f32.gmra.mrb[14].mxu0 %vm1828_vm9, %v4238_v61  ;;  %1705 = vrot.lane.b32.xlu1 %v3010_v45, %s3306_s29 }
 0x1e3   : > { %1514 = vrot.lane.b32.xlu0 %v2979_v7, %s3305_s28 }
 0x1e4   : > { %v1686_v54 = vpop.permute.xlu1 %1685 }
 0x1e5   : > { %v1495_v42 = vpop.permute.xlu0 %1494  ;;  %1766 = vst.msk [vmem:[#allocation2 + $0x80] sm:$0xff] %vm1749_vm8, %v1686_v54 }
 0x1e6   : > { %1574 = vst.msk [vmem:[#allocation2 + $0x88] sm:$0xff] %vm1556_vm7, %v1495_v42  ;;  %1129 = vrot.lane.b32.xlu1 %v3010_v45, %s3303_s22 }
 0x1e7   : > { %938 = vrot.lane.b32.xlu0 %v2979_v7, %s3302_s21 }
 0x1e8   : > { %v1110_v24 = vpop.permute.xlu1 %1109 }
 0x1e9   : > { %v919_v25 = vpop.permute.xlu0 %918  ;;  %1188 = vst.msk [vmem:[#allocation2 + $0x90] sm:$0xff] %vm1169_vm5, %v1110_v24 }
 0x1ea   : > { %996 = vst.msk [vmem:[#allocation2 + $0x98] sm:$0xff] %vm976_vm4, %v919_v25  ;;  %1131 = vrot.lane.b32.xlu1 %v2917_v62, %s3303_s22 }
 0x1eb   : > { %1707 = vrot.lane.b32.xlu0 %v2917_v62, %s3306_s29 }
 0x1ec   : > { %v1112_v36 = vpop.permute.xlu1 %1111  ;;  %v4256_v1 = vld [vmem:[#allocation2 + $0x80] sm:$0xff] }
 0x1ed   : > { %v1688_v37 = vpop.permute.xlu0 %1687  ;;  %1189 = vst.msk [vmem:[#allocation2 + $0x98] sm:$0xff] %vm1169_vm5, %v1112_v36  ;;  %3187 = vmatprep.mubr.msk.f32.mxu0 %vm1828_vm9, %v4256_v1 }
 0x1ee   : > { %1767 = vst.msk [vmem:[#allocation2 + $0x88] sm:$0xff] %vm1749_vm8, %v1688_v37  ;;  %747 = vrot.lane.b32.xlu1 %v2854_v9, %s3301_s20 }
 0x1ef   : > { %1323 = vrot.lane.b32.xlu0 %v2854_v9, %s3304_s23 }
 0x1f0   : > { %v1306_v46 = vpop.permute.xlu1 %1305 }
 0x1f1   : > { %v1304_v26 = vpop.permute.xlu0 %1303  ;;  %1383 = vst.msk [vmem:[#allocation2 + $0x98] sm:$0xff] %vm1363_vm6, %v1306_v46 }
 0x1f2   : > { %1382 = vst.msk [vmem:[#allocation2 + $0x90] sm:$0xff] %vm1363_vm6, %v1304_v26  ;;  %1516 = vrot.lane.b32.xlu1 %v2980_v0, %s3305_s28 }
 0x1f3   : > { %1325 = vrot.lane.b32.xlu0 %v2949_v8, %s3304_s23 }
 0x1f4   : > { %v921_v27 = vpop.permute.xlu1 %920 }
 0x1f5   : > { %v1497_v11 = vpop.permute.xlu0 %1496  ;;  %v4270_v13 = vld [vmem:[#allocation2 + $0x88] sm:$0xff]  ;;  %997 = vst.msk [vmem:[#allocation2 + $0xa0] sm:$0xff] %vm976_vm4, %v921_v27 }
 0x1f6   : > { %1575 = vst.msk [vmem:[#allocation2 + $0x90] sm:$0xff] %vm1556_vm7, %v1497_v11  ;;  %3188 = vmatmul.mubr.msk.f32.gmra.mrb[16].mxu0 %vm1828_vm9, %v4270_v13  ;;  %940 = vrot.lane.b32.xlu1 %v2980_v0, %s3302_s21 }
 0x1f7   : > { %749 = vrot.lane.b32.xlu0 %v2949_v8, %s3301_s20 }
 0x1f8   : > { %v1690_v38 = vpop.permute.xlu1 %1689 }
 0x1f9   : > { %v1499_v39 = vpop.permute.xlu0 %1498  ;;  %1768 = vst.msk [vmem:[#allocation2 + $0x90] sm:$0xff] %vm1749_vm8, %v1690_v38 }
 0x1fa   : > { %1576 = vst.msk [vmem:[#allocation2 + $0x98] sm:$0xff] %vm1556_vm7, %v1499_v39  ;;  %1709 = vrot.lane.b32.xlu1 %v3012_v17, %s3306_s29 }
 0x1fb   : > { %1518 = vrot.lane.b32.xlu0 %v2981_v10, %s3305_s28 }
 0x1fc   : > { %v1114_v47 = vpop.permute.xlu1 %1113 }
 0x1fd   : > { %v923_v19 = vpop.permute.xlu0 %922  ;;  %1190 = vst.msk [vmem:[#allocation2 + $0xa0] sm:$0xff] %vm1169_vm5, %v1114_v47 }
 0x1fe   : > { %998 = vst.msk [vmem:[#allocation2 + $0xa8] sm:$0xff] %vm976_vm4, %v923_v19  ;;  %1133 = vrot.lane.b32.xlu1 %v3012_v17, %s3303_s22 }
 0x1ff   : > { %942 = vrot.lane.b32.xlu0 %v2981_v10, %s3302_s21 }
 0x200   : > { %v1116_v14 = vpop.permute.xlu1 %1115  ;;  %v4295_v49 = vld [vmem:[#allocation2 + $0x90] sm:$0xff] }
 0x201   : > { %v1692_v50 = vpop.permute.xlu0 %1691  ;;  %1191 = vst.msk [vmem:[#allocation2 + $0xa8] sm:$0xff] %vm1169_vm5, %v1116_v14  ;;  %3190 = vmatprep.mubr.msk.f32.mxu0 %vm1828_vm9, %v4295_v49 }
 0x202   : > { %1769 = vst.msk [vmem:[#allocation2 + $0x98] sm:$0xff] %vm1749_vm8, %v1692_v50  ;;  %1135 = vrot.lane.b32.xlu1 %v2919_v15, %s3303_s22 }
 0x203   : > { %1711 = vrot.lane.b32.xlu0 %v2919_v15, %s3306_s29 }
 0x204   : > { %v1310_v33 = vpop.permute.xlu1 %1309 }
 0x205   : > { %v1308_v21 = vpop.permute.xlu0 %1307  ;;  %1385 = vst.msk [vmem:[#allocation2 + $0xa8] sm:$0xff] %vm1363_vm6, %v1310_v33 }
 0x206   : > { %1384 = vst.msk [vmem:[#allocation2 + $0xa0] sm:$0xff] %vm1363_vm6, %v1308_v21  ;;  %1329 = vrot.lane.b32.xlu1 %v2951_v56, %s3304_s23 }
 0x207   : > { %1327 = vrot.lane.b32.xlu0 %v2950_v40, %s3304_s23 }
 0x208   : > { %v925_v52 = vpop.permute.xlu1 %924 }
 0x209   : > { %v1501_v4 = vpop.permute.xlu0 %1500  ;;  %v4314_v29 = vld [vmem:[#allocation2 + $0x98] sm:$0xff]  ;;  %999 = vst.msk [vmem:[#allocation2 + $0xb0] sm:$0xff] %vm976_vm4, %v925_v52 }
 0x20a   : > { %1577 = vst.msk [vmem:[#allocation2 + $0xa0] sm:$0xff] %vm1556_vm7, %v1501_v4  ;;  %3191 = vmatmul.mubr.msk.f32.gmra.mrb[18].mxu0 %vm1828_vm9, %v4314_v29  ;;  %1522 = vrot.lane.b32.xlu1 %v2983_v12, %s3305_s28 }
 0x20b   : > { %1520 = vrot.lane.b32.xlu0 %v2982_v16, %s3305_s28 }
 0x20c   : > { %v1694_v58 = vpop.permute.xlu1 %1693 }
 0x20d   : > { %v1503_v35 = vpop.permute.xlu0 %1502  ;;  %1770 = vst.msk [vmem:[#allocation2 + $0xa0] sm:$0xff] %vm1749_vm8, %v1694_v58 }
 0x20e   : > { %1578 = vst.msk [vmem:[#allocation2 + $0xa8] sm:$0xff] %vm1556_vm7, %v1503_v35  ;;  %1715 = vrot.lane.b32.xlu1 %v3015_v51, %s3306_s29 }
 0x20f   : > { %1713 = vrot.lane.b32.xlu0 %v3014_v18, %s3306_s29 }
 0x210   : > { %v1118_v44 = vpop.permute.xlu1 %1117 }
 0x211   : > { %v927_v45 = vpop.permute.xlu0 %926  ;;  %1192 = vst.msk [vmem:[#allocation2 + $0xb0] sm:$0xff] %vm1169_vm5, %v1118_v44 }
 0x212   : > { %1000 = vst.msk [vmem:[#allocation2 + $0xb8] sm:$0xff] %vm976_vm4, %v927_v45  ;;  %2217 = vrot.lane.b32.xlu1 %v4001_v6, %s3307_s11 }
 0x213   : > { %2215 = vrot.lane.b32.xlu0 %v3987_v22, %s3307_s11 }
 0x214   : > { %v1120_v7 = vpop.permute.xlu1 %1119  ;;  %v4334_v60 = vld [vmem:[#allocation2 + $0xa0] sm:$0xff] }
 0x215   : > { %v1696_v59 = vpop.permute.xlu0 %1695  ;;  %1193 = vst.msk [vmem:[#allocation2 + $0xb8] sm:$0xff] %vm1169_vm5, %v1120_v7  ;;  %3193 = vmatprep.mubr.msk.f32.mxu0 %vm1828_vm9, %v4334_v60 }
 0x216   : > { %1771 = vst.msk [vmem:[#allocation2 + $0xa8] sm:$0xff] %vm1749_vm8, %v1696_v59  ;;  %2221 = vrot.lane.b32.xlu1 %v4035_v2, %s3307_s11 }
 0x217   : > { %2219 = vrot.lane.b32.xlu0 %v4022_v63, %s3307_s11 }
 0x218   : > { %v736_v6 = vpop.permute.xlu1 %735 }
 0x219   : > { %v1312_v54 = vpop.permute.xlu0 %1311  ;;  %808 = vst.msk [vmem:[#allocation2 + $0xc0] sm:$0xff] %vm783_vm3, %v736_v6 }
 0x21a   : > { %1386 = vst.msk [vmem:[#allocation2 + $0xb0] sm:$0xff] %vm1363_vm6, %v1312_v54  ;;  %2225 = vrot.lane.b32.xlu1 %v4069_v20, %s3307_s11 }
 0x21b   : > { %2223 = vrot.lane.b32.xlu0 %v4056_v48, %s3307_s11 }
 0x21c   : > { %v1505_v22 = vpop.permute.xlu1 %1504 }
 0x21d   : > { %v1314_v42 = vpop.permute.xlu0 %1313  ;;  %v1803_v62 = vld [vmem:[#allocation2 + $0xa8] sm:$0xff]  ;;  %1579 = vst.msk [vmem:[#allocation2 + $0xb0] sm:$0xff] %vm1556_vm7, %v1505_v22 }
 0x21e   : > { %1387 = vst.msk [vmem:[#allocation2 + $0xb8] sm:$0xff] %vm1363_vm6, %v1314_v42  ;;  %3194 = vmatmul.mubr.msk.f32.gmra.mrb[20].mxu0 %vm1828_vm9, %v1803_v62  ;;  %2229 = vrot.lane.b32.xlu1 %v4103_v57, %s3307_s11 }
 0x21f   : > { %2227 = vrot.lane.b32.xlu0 %v4090_v32, %s3307_s11  ;;  %v4372_v32 = vld [vmem:[%s4726_s2] ss:$0 sm:$0xff] }
 0x220   : > { %v929_v63 = vpop.permute.xlu1 %928 }
 0x221   : > { %v738_v2 = vpop.permute.xlu0 %737  ;;  %1001 = vst.msk [vmem:[#allocation2 + $0xc0] sm:$0xff] %vm976_vm4, %v929_v63 }
 0x222   : > { %809 = vst.msk [vmem:[#allocation2 + $0xc8] sm:$0xff] %vm783_vm3, %v738_v2  ;;  %2233 = vrot.lane.b32.xlu1 %v4138_v30, %s3307_s11 }
 0x223   : > { %2231 = vrot.lane.b32.xlu0 %v4124_v23, %s3307_s11 }
 0x224   : > { %v1698_v48 = vpop.permute.xlu1 %1697 }
 0x225   : > { %v1507_v20 = vpop.permute.xlu0 %1506  ;;  %1772 = vst.msk [vmem:[#allocation2 + $0xb0] sm:$0xff] %vm1749_vm8, %v1698_v48 }
 0x226   : > { %1580 = vst.msk [vmem:[#allocation2 + $0xb8] sm:$0xff] %vm1556_vm7, %v1507_v20  ;;  %2237 = vrot.lane.b32.xlu1 %v4171_v3, %s3307_s11 }
 0x227   : > { %2235 = vrot.lane.b32.xlu0 %v4158_v43, %s3307_s11 }
 0x228   : > { %v1122_v57 = vpop.permute.xlu1 %1121 }
 0x229   : > { %v931_v30 = vpop.permute.xlu0 %930  ;;  %1194 = vst.msk [vmem:[#allocation2 + $0xc0] sm:$0xff] %vm1169_vm5, %v1122_v57  ;;  %v3165_v23 = vpop.f32.mrb[0].mxu0 }
 0x22a   : > { %1002 = vst.msk [vmem:[#allocation2 + $0xc8] sm:$0xff] %vm976_vm4, %v931_v30  ;;  %v1997_v24 = vadd.f32 %v3165_v23, %v4372_v32  ;;  %v1991_v25 = vpop.f32.mrb[1].mxu0  ;;  %2241 = vrot.lane.b32.xlu1 %v4204_v41, %s3307_s11 }
 0x22b   : > { %2239 = vrot.lane.b32.xlu0 %v4190_v5, %s3307_s11  ;;  %v1992_v43 = vadd.f32 %v4372_v32, %v1991_v25 }
 0x22c   : > { %v2151_v3 = vmax.f32 %v1997_v24, 0.0  ;;  %v1124_v9 = vpop.permute.xlu1 %1123  ;;  %v1804_v37 = vld [vmem:[#allocation2 + $0xb0] sm:$0xff] }
 0x22d   : > { %v1700_v36 = vpop.permute.xlu0 %1699  ;;  %v2150_v0 = vmax.f32 %v1992_v43, 0.0  ;;  %1195 = vst.msk [vmem:[#allocation2 + $0xc8] sm:$0xff] %vm1169_vm5, %v1124_v9  ;;  %3196 = vmatprep.mubr.msk.f32.mxu0 %vm1828_vm9, %v1804_v37 }
 0x22e   : > { %1773 = vst.msk [vmem:[#allocation2 + $0xb8] sm:$0xff] %vm1749_vm8, %v1700_v36  ;;  %2245 = vrot.lane.b32.xlu1 %v4238_v61, %s3307_s11 }
 0x22f   : > { %2184 = vst.msk [vmem:[%s4385_s19 + $0x8] sm:$0xff] %vm2182_vm10, %v2151_v3  ;;  %2243 = vrot.lane.b32.xlu0 %v4224_v34, %s3307_s11  ;;  %2183 = vst.msk [vmem:[%s4385_s19] sm:$0xff] %vm2182_vm10, %v2150_v0 }
 0x230   : > { %v740_v5 = vpop.permute.xlu1 %739 }
 0x231   : > { %v1316_v41 = vpop.permute.xlu0 %1315  ;;  %810 = vst.msk [vmem:[#allocation2 + $0xd0] sm:$0xff] %vm783_vm3, %v740_v5 }
 0x232   : > { %1388 = vst.msk [vmem:[#allocation2 + $0xc0] sm:$0xff] %vm1363_vm6, %v1316_v41  ;;  %2249 = vrot.lane.b32.xlu1 %v4270_v13, %s3307_s11 }
 0x233   : > { %2247 = vrot.lane.b32.xlu0 %v4256_v1, %s3307_s11 }
 0x234   : > { %v1509_v8 = vpop.permute.xlu1 %1508 }
 0x235   : > { %v1318_v46 = vpop.permute.xlu0 %1317  ;;  %v1805_v61 = vld [vmem:[#allocation2 + $0xb8] sm:$0xff]  ;;  %1581 = vst.msk [vmem:[#allocation2 + $0xc0] sm:$0xff] %vm1556_vm7, %v1509_v8 }
 0x236   : > { %1389 = vst.msk [vmem:[#allocation2 + $0xc8] sm:$0xff] %vm1363_vm6, %v1318_v46  ;;  %3197 = vmatmul.mubr.msk.f32.gmra.mrb[22].mxu0 %vm1828_vm9, %v1805_v61  ;;  %2253 = vrot.lane.b32.xlu1 %v4314_v29, %s3307_s11 }
 0x237   : > { %2251 = vrot.lane.b32.xlu0 %v4295_v49, %s3307_s11 }
 0x238   : > { %v933_v34 = vpop.permute.xlu1 %932 }
 0x239   : > { %v742_v26 = vpop.permute.xlu0 %741  ;;  %1003 = vst.msk [vmem:[#allocation2 + $0xd0] sm:$0xff] %vm976_vm4, %v933_v34 }
 0x23a   : > { %811 = vst.msk [vmem:[#allocation2 + $0xd8] sm:$0xff] %vm783_vm3, %v742_v26  ;;  %2257 = vrot.lane.b32.xlu1 %v1803_v62, %s3307_s11 }
 0x23b   : > { %2255 = vrot.lane.b32.xlu0 %v4334_v60, %s3307_s11 }
 0x23c   : > { %v1702_v1 = vpop.permute.xlu1 %1701 }
 0x23d   : > { %v1511_v27 = vpop.permute.xlu0 %1510  ;;  %1774 = vst.msk [vmem:[#allocation2 + $0xc0] sm:$0xff] %vm1749_vm8, %v1702_v1  ;;  %v3168_v11 = vpop.f32.mrb[2].mxu0 }
 0x23e   : > { %1582 = vst.msk [vmem:[#allocation2 + $0xc8] sm:$0xff] %vm1556_vm7, %v1511_v27  ;;  %v2007_v13 = vadd.f32 %v3168_v11, %v4372_v32  ;;  %v2001_v17 = vpop.f32.mrb[3].mxu0  ;;  %2261 = vrot.lane.b32.xlu1 %v1805_v61, %s3307_s11 }
 0x23f   : > { %2259 = vrot.lane.b32.xlu0 %v1804_v37, %s3307_s11  ;;  %v2002_v10 = vadd.f32 %v4372_v32, %v2001_v17 }
 0x240   : > { %v2153_v38 = vmax.f32 %v2007_v13, 0.0  ;;  %v1126_v39 = vpop.permute.xlu1 %1125 }
 0x241   : > { %v935_v47 = vpop.permute.xlu0 %934  ;;  %v2152_v19 = vmax.f32 %v2002_v10, 0.0  ;;  %1196 = vst.msk [vmem:[#allocation2 + $0xd0] sm:$0xff] %vm1169_vm5, %v1126_v39 }
 0x242   : > { %1004 = vst.msk [vmem:[#allocation2 + $0xd8] sm:$0xff] %vm976_vm4, %v935_v47 }
 0x243   : > { %2186 = vst.msk [vmem:[%s4385_s19 + $0x18] sm:$0xff] %vm2182_vm10, %v2153_v38  ;;  %2185 = vst.msk [vmem:[%s4385_s19 + $0x10] sm:$0xff] %vm2182_vm10, %v2152_v19 }
 0x244   : > { %v1128_v28 = vpop.permute.xlu1 %1127  ;;  %v1806_v15 = vld [vmem:[#allocation2 + $0xc0] sm:$0xff] }
 0x245   : > { %v1704_v31 = vpop.permute.xlu0 %1703  ;;  %1197 = vst.msk [vmem:[#allocation2 + $0xd8] sm:$0xff] %vm1169_vm5, %v1128_v28  ;;  %2263 = vrot.lane.b32.xlu0 %v1806_v15, %s3307_s11  ;;  %3199 = vmatprep.mubr.msk.f32.mxu0 %vm1828_vm9, %v1806_v15 }
 0x246   : > { %1775 = vst.msk [vmem:[#allocation2 + $0xc8] sm:$0xff] %vm1749_vm8, %v1704_v31 }
 0x248   : > { %v744_v53 = vpop.permute.xlu1 %743 }
 0x249   : > { %v1320_v14 = vpop.permute.xlu0 %1319  ;;  %812 = vst.msk [vmem:[#allocation2 + $0xe0] sm:$0xff] %vm783_vm3, %v744_v53 }
 0x24a   : > { %1390 = vst.msk [vmem:[#allocation2 + $0xd0] sm:$0xff] %vm1363_vm6, %v1320_v14 }
 0x24c   : > { %v1513_v50 = vpop.permute.xlu1 %1512 }
 0x24d   : > { %v1322_v49 = vpop.permute.xlu0 %1321  ;;  %v1807_v55 = vld [vmem:[#allocation2 + $0xc8] sm:$0xff]  ;;  %1583 = vst.msk [vmem:[#allocation2 + $0xd0] sm:$0xff] %vm1556_vm7, %v1513_v50 }
 0x24e   : > { %1391 = vst.msk [vmem:[#allocation2 + $0xd8] sm:$0xff] %vm1363_vm6, %v1322_v49  ;;  %2265 = vrot.lane.b32.xlu1 %v1807_v55, %s3307_s11  ;;  %3200 = vmatmul.mubr.msk.f32.gmra.mrb[24].mxu0 %vm1828_vm9, %v1807_v55 }
 0x250   : > { %v937_v56 = vpop.permute.xlu1 %936 }
 0x251   : > { %v746_v40 = vpop.permute.xlu0 %745  ;;  %1005 = vst.msk [vmem:[#allocation2 + $0xe0] sm:$0xff] %vm976_vm4, %v937_v56  ;;  %v3171_v33 = vpop.f32.mrb[4].mxu0 }
 0x252   : > { %813 = vst.msk [vmem:[#allocation2 + $0xe8] sm:$0xff] %vm783_vm3, %v746_v40  ;;  %v2017_v21 = vadd.f32 %v3171_v33, %v4372_v32  ;;  %v2011_v12 = vpop.f32.mrb[5].mxu0 }
 0x253   : > { %v2012_v16 = vadd.f32 %v4372_v32, %v2011_v12 }
 0x254   : > { %v2155_v52 = vmax.f32 %v2017_v21, 0.0  ;;  %v1706_v4 = vpop.permute.xlu1 %1705 }
 0x255   : > { %v1515_v29 = vpop.permute.xlu0 %1514  ;;  %v2154_v51 = vmax.f32 %v2012_v16, 0.0  ;;  %1776 = vst.msk [vmem:[#allocation2 + $0xd0] sm:$0xff] %vm1749_vm8, %v1706_v4 }
 0x256   : > { %1584 = vst.msk [vmem:[#allocation2 + $0xd8] sm:$0xff] %vm1556_vm7, %v1515_v29 }
 0x257   : > { %2188 = vst.msk [vmem:[%s4385_s19 + $0x28] sm:$0xff] %vm2182_vm10, %v2155_v52  ;;  %2187 = vst.msk [vmem:[%s4385_s19 + $0x20] sm:$0xff] %vm2182_vm10, %v2154_v51 }
 0x258   : > { %v1130_v18 = vpop.permute.xlu1 %1129 }
 0x259   : > { %v939_v58 = vpop.permute.xlu0 %938  ;;  %1198 = vst.msk [vmem:[#allocation2 + $0xe0] sm:$0xff] %vm1169_vm5, %v1130_v18 }
 0x25a   : > { %1006 = vst.msk [vmem:[#allocation2 + $0xe8] sm:$0xff] %vm976_vm4, %v939_v58 }
 0x25c   : > { %v1132_v35 = vpop.permute.xlu1 %1131  ;;  %v1808_v45 = vld [vmem:[#allocation2 + $0xd0] sm:$0xff] }
 0x25d   : > { %v1708_v44 = vpop.permute.xlu0 %1707  ;;  %1199 = vst.msk [vmem:[#allocation2 + $0xe8] sm:$0xff] %vm1169_vm5, %v1132_v35  ;;  %2267 = vrot.lane.b32.xlu0 %v1808_v45, %s3307_s11  ;;  %3202 = vmatprep.mubr.msk.f32.mxu0 %vm1828_vm9, %v1808_v45 }
 0x25e   : > { %1777 = vst.msk [vmem:[#allocation2 + $0xd8] sm:$0xff] %vm1749_vm8, %v1708_v44 }
 0x260   : > { %v748_v7 = vpop.permute.xlu1 %747 }
 0x261   : > { %v1324_v59 = vpop.permute.xlu0 %1323  ;;  %814 = vst.msk [vmem:[#allocation2 + $0xf0] sm:$0xff] %vm783_vm3, %v748_v7 }
 0x262   : > { %1392 = vst.msk [vmem:[#allocation2 + $0xe0] sm:$0xff] %vm1363_vm6, %v1324_v59 }
 0x264   : > { %v1517_v60 = vpop.permute.xlu1 %1516 }
 0x265   : > { %v1326_v6 = vpop.permute.xlu0 %1325  ;;  %v1809_v54 = vld [vmem:[#allocation2 + $0xd8] sm:$0xff]  ;;  %1585 = vst.msk [vmem:[#allocation2 + $0xe0] sm:$0xff] %vm1556_vm7, %v1517_v60  ;;  %v3174_v22 = vpop.f32.mrb[6].mxu0 }
 0x266   : > { %1393 = vst.msk [vmem:[#allocation2 + $0xe8] sm:$0xff] %vm1363_vm6, %v1326_v6  ;;  %2269 = vrot.lane.b32.xlu1 %v1809_v54, %s3307_s11  ;;  %3203 = vmatmul.mubr.msk.f32.gmra.mrb[26].mxu0 %vm1828_vm9, %v1809_v54  ;;  %v2027_v42 = vadd.f32 %v3174_v22, %v4372_v32  ;;  %v2021_v62 = vpop.f32.mrb[7].mxu0 }
 0x267   : > { %v2022_v63 = vadd.f32 %v4372_v32, %v2021_v62 }
 0x268   : > { %v2157_v2 = vmax.f32 %v2027_v42, 0.0  ;;  %v941_v48 = vpop.permute.xlu1 %940 }
 0x269   : > { %v750_v20 = vpop.permute.xlu0 %749  ;;  %v2156_v57 = vmax.f32 %v2022_v63, 0.0  ;;  %1007 = vst.msk [vmem:[#allocation2 + $0xf0] sm:$0xff] %vm976_vm4, %v941_v48 }
 0x26a   : > { %815 = vst.msk [vmem:[#allocation2 + $0xf8] sm:$0xff] %vm783_vm3, %v750_v20 }
 0x26b   : > { %2190 = vst.msk [vmem:[%s4385_s19 + $0x38] sm:$0xff] %vm2182_vm10, %v2157_v2  ;;  %2189 = vst.msk [vmem:[%s4385_s19 + $0x30] sm:$0xff] %vm2182_vm10, %v2156_v57 }
 0x26c   : > { %v1710_v30 = vpop.permute.xlu1 %1709 }
 0x26d   : > { %v1519_v23 = vpop.permute.xlu0 %1518  ;;  %1778 = vst.msk [vmem:[#allocation2 + $0xe0] sm:$0xff] %vm1749_vm8, %v1710_v30 }
 0x26e   : > { %1586 = vst.msk [vmem:[#allocation2 + $0xe8] sm:$0xff] %vm1556_vm7, %v1519_v23 }
 0x270   : > { %v1134_v24 = vpop.permute.xlu1 %1133 }
 0x271   : > { %v943_v25 = vpop.permute.xlu0 %942  ;;  %1200 = vst.msk [vmem:[#allocation2 + $0xf0] sm:$0xff] %vm1169_vm5, %v1134_v24 }
 0x272   : > { %1008 = vst.msk [vmem:[#allocation2 + $0xf8] sm:$0xff] %vm976_vm4, %v943_v25 }
 0x274   : > { %v1136_v43 = vpop.permute.xlu1 %1135  ;;  %v1810_v9 = vld [vmem:[#allocation2 + $0xe0] sm:$0xff] }
 0x275   : > { %v1712_v3 = vpop.permute.xlu0 %1711  ;;  %1201 = vst.msk [vmem:[#allocation2 + $0xf8] sm:$0xff] %vm1169_vm5, %v1136_v43  ;;  %2271 = vrot.lane.b32.xlu0 %v1810_v9, %s3307_s11  ;;  %3205 = vmatprep.mubr.msk.f32.mxu0 %vm1828_vm9, %v1810_v9 }
 0x276   : > { %1779 = vst.msk [vmem:[#allocation2 + $0xe8] sm:$0xff] %vm1749_vm8, %v1712_v3 }
 0x278   : > { %v1330_v36 = vpop.permute.xlu1 %1329 }
 0x279   : > { %v1328_v37 = vpop.permute.xlu0 %1327  ;;  %1395 = vst.msk [vmem:[#allocation2 + $0xf8] sm:$0xff] %vm1363_vm6, %v1330_v36  ;;  %v3177_v0 = vpop.f32.mrb[8].mxu0 }
 0x27a   : > { %1394 = vst.msk [vmem:[#allocation2 + $0xf0] sm:$0xff] %vm1363_vm6, %v1328_v37  ;;  %v2037_v5 = vadd.f32 %v3177_v0, %v4372_v32  ;;  %v2031_v41 = vpop.f32.mrb[9].mxu0 }
 0x27b   : > { %v2032_v8 = vadd.f32 %v4372_v32, %v2031_v41 }
 0x27c   : > { %v2159_v46 = vmax.f32 %v2037_v5, 0.0  ;;  %v1523_v61 = vpop.permute.xlu1 %1522 }
 0x27d   : > { %v1521_v34 = vpop.permute.xlu0 %1520  ;;  %v1811_v26 = vld [vmem:[#allocation2 + $0xe8] sm:$0xff]  ;;  %v2158_v1 = vmax.f32 %v2032_v8, 0.0  ;;  %1588 = vst.msk [vmem:[#allocation2 + $0xf8] sm:$0xff] %vm1556_vm7, %v1523_v61 }
 0x27e   : > { %1587 = vst.msk [vmem:[#allocation2 + $0xf0] sm:$0xff] %vm1556_vm7, %v1521_v34  ;;  %2273 = vrot.lane.b32.xlu1 %v1811_v26, %s3307_s11  ;;  %3206 = vmatmul.mubr.msk.f32.gmra.mrb[28].mxu0 %vm1828_vm9, %v1811_v26 }
 0x27f   : > { %2192 = vst.msk [vmem:[%s4385_s19 + $0x48] sm:$0xff] %vm2182_vm10, %v2159_v46  ;;  %2191 = vst.msk [vmem:[%s4385_s19 + $0x40] sm:$0xff] %vm2182_vm10, %v2158_v1 }
 0x280   : > { %v1716_v27 = vpop.permute.xlu1 %1715 }
 0x281   : > { %v1714_v11 = vpop.permute.xlu0 %1713  ;;  %1781 = vst.msk [vmem:[#allocation2 + $0xf8] sm:$0xff] %vm1749_vm8, %v1716_v27 }
 0x282   : > { %1780 = vst.msk [vmem:[#allocation2 + $0xf0] sm:$0xff] %vm1749_vm8, %v1714_v11 }
 0x284   : > { %v2218_v13 = vpop.permute.xlu1 %2217 }
 0x285   : > { %v2216_v17 = vpop.permute.xlu0 %2215 }
 0x286   : > { %3217 = vmatprep.mubr.msk.f32.mxu1 %vm1828_vm9, %v2216_v17 }
 0x287   : > { %3218 = vmatmul.mubr.msk.f32.vlgmr.msra.gmra.mrb[0].mxu1 %vm1828_vm9, %v2218_v13 }
 0x288   : > { %v2222_v10 = vpop.permute.xlu1 %2221  ;;  %v1813_v47 = vld [vmem:[#allocation2 + $0xf8] sm:$0xff] }
 0x289   : > { %v2220_v38 = vpop.permute.xlu0 %2219  ;;  %v1812_v39 = vld [vmem:[#allocation2 + $0xf0] sm:$0xff]  ;;  %2277 = vrot.lane.b32.xlu1 %v1813_v47, %s3307_s11 }
 0x28a   : > { %2275 = vrot.lane.b32.xlu0 %v1812_v39, %s3307_s11  ;;  %3208 = vmatprep.mubr.msk.f32.mxu0 %vm1828_vm9, %v1812_v39 }
 0x28b   : > { %3220 = vmatprep.mubr.msk.f32.mxu1 %vm1828_vm9, %v2220_v38  ;;  %3209 = vmatmul.mubr.msk.f32.gmra.mrb[30].mxu0 %vm1828_vm9, %v1813_v47 }
 0x28c   : > { %3221 = vmatmul.mubr.msk.f32.gmra.mrb[2].mxu1 %vm1828_vm9, %v2222_v10  ;;  %v2226_v19 = vpop.permute.xlu1 %2225 }
 0x28d   : > { %v2224_v28 = vpop.permute.xlu0 %2223  ;;  %v3180_v31 = vpop.f32.mrb[10].mxu0 }
 0x28e   : > { %3223 = vmatprep.mubr.msk.f32.mxu1 %vm1828_vm9, %v2224_v28  ;;  %v2047_v15 = vadd.f32 %v3180_v31, %v4372_v32  ;;  %v2041_v53 = vpop.f32.mrb[11].mxu0 }
 0x28f   : > { %v2042_v14 = vadd.f32 %v4372_v32, %v2041_v53 }
 0x290   : > { %3224 = vmatmul.mubr.msk.f32.gmra.mrb[4].mxu1 %vm1828_vm9, %v2226_v19  ;;  %v2161_v50 = vmax.f32 %v2047_v15, 0.0  ;;  %v2230_v49 = vpop.permute.xlu1 %2229 }
 0x291   : > { %v2228_v55 = vpop.permute.xlu0 %2227  ;;  %v2160_v56 = vmax.f32 %v2042_v14, 0.0 }
 0x292   : > { %3226 = vmatprep.mubr.msk.f32.mxu1 %vm1828_vm9, %v2228_v55  ;;  %2194 = vst.msk [vmem:[%s4385_s19 + $0x58] sm:$0xff] %vm2182_vm10, %v2161_v50 }
 0x293   : > { %2193 = vst.msk [vmem:[%s4385_s19 + $0x50] sm:$0xff] %vm2182_vm10, %v2160_v56 }
 0x294   : > { %3227 = vmatmul.mubr.msk.f32.gmra.mrb[6].mxu1 %vm1828_vm9, %v2230_v49  ;;  %v2234_v40 = vpop.permute.xlu1 %2233 }
 0x295   : > { %v2232_v33 = vpop.permute.xlu0 %2231 }
 0x296   : > { %3229 = vmatprep.mubr.msk.f32.mxu1 %vm1828_vm9, %v2232_v33 }
 0x298   : > { %3230 = vmatmul.mubr.msk.f32.gmra.mrb[8].mxu1 %vm1828_vm9, %v2234_v40  ;;  %v2238_v21 = vpop.permute.xlu1 %2237 }
 0x299   : > { %v2236_v12 = vpop.permute.xlu0 %2235 }
 0x29a   : > { %3232 = vmatprep.mubr.msk.f32.mxu1 %vm1828_vm9, %v2236_v12 }
 0x29c   : > { %3233 = vmatmul.mubr.msk.f32.gmra.mrb[10].mxu1 %vm1828_vm9, %v2238_v21  ;;  %v2242_v16 = vpop.permute.xlu1 %2241 }
 0x29d   : > { %v2240_v52 = vpop.permute.xlu0 %2239 }
 0x29e   : > { %3235 = vmatprep.mubr.msk.f32.mxu1 %vm1828_vm9, %v2240_v52 }
 0x2a0   : > { %3236 = vmatmul.mubr.msk.f32.gmra.mrb[12].mxu1 %vm1828_vm9, %v2242_v16  ;;  %v2246_v4 = vpop.permute.xlu1 %2245 }
 0x2a1   : > { %v2244_v29 = vpop.permute.xlu0 %2243  ;;  %v3183_v51 = vpop.f32.mrb[12].mxu0 }
 0x2a2   : > { %3238 = vmatprep.mubr.msk.f32.mxu1 %vm1828_vm9, %v2244_v29  ;;  %v2057_v18 = vadd.f32 %v3183_v51, %v4372_v32  ;;  %v2051_v58 = vpop.f32.mrb[13].mxu0 }
 0x2a3   : > { %v2052_v35 = vadd.f32 %v4372_v32, %v2051_v58 }
 0x2a4   : > { %3239 = vmatmul.mubr.msk.f32.gmra.mrb[14].mxu1 %vm1828_vm9, %v2246_v4  ;;  %v2163_v44 = vmax.f32 %v2057_v18, 0.0  ;;  %v2250_v45 = vpop.permute.xlu1 %2249 }
 0x2a5   : > { %v2248_v7 = vpop.permute.xlu0 %2247  ;;  %v2162_v59 = vmax.f32 %v2052_v35, 0.0 }
 0x2a6   : > { %3241 = vmatprep.mubr.msk.f32.mxu1 %vm1828_vm9, %v2248_v7  ;;  %2196 = vst.msk [vmem:[%s4385_s19 + $0x68] sm:$0xff] %vm2182_vm10, %v2163_v44 }
 0x2a7   : > { %2195 = vst.msk [vmem:[%s4385_s19 + $0x60] sm:$0xff] %vm2182_vm10, %v2162_v59 }
 0x2a8   : > { %3242 = vmatmul.mubr.msk.f32.gmra.mrb[16].mxu1 %vm1828_vm9, %v2250_v45  ;;  %v2254_v60 = vpop.permute.xlu1 %2253 }
 0x2a9   : > { %v2252_v6 = vpop.permute.xlu0 %2251 }
 0x2aa   : > { %3244 = vmatprep.mubr.msk.f32.mxu1 %vm1828_vm9, %v2252_v6 }
 0x2ac   : > { %3245 = vmatmul.mubr.msk.f32.gmra.mrb[18].mxu1 %vm1828_vm9, %v2254_v60  ;;  %v2258_v54 = vpop.permute.xlu1 %2257 }
 0x2ad   : > { %v2256_v22 = vpop.permute.xlu0 %2255 }
 0x2ae   : > { %3247 = vmatprep.mubr.msk.f32.mxu1 %vm1828_vm9, %v2256_v22 }
 0x2b0   : > { %3248 = vmatmul.mubr.msk.f32.gmra.mrb[20].mxu1 %vm1828_vm9, %v2258_v54  ;;  %v2262_v42 = vpop.permute.xlu1 %2261 }
 0x2b1   : > { %v2260_v62 = vpop.permute.xlu0 %2259 }
 0x2b2   : > { %3250 = vmatprep.mubr.msk.f32.mxu1 %vm1828_vm9, %v2260_v62 }
 0x2b4   : > { %3251 = vmatmul.mubr.msk.f32.gmra.mrb[22].mxu1 %vm1828_vm9, %v2262_v42 }
 0x2b5   : > { %v3186_v63 = vpop.f32.mrb[14].mxu0 }
 0x2b6   : > { %v2067_v2 = vadd.f32 %v3186_v63, %v4372_v32  ;;  %v2061_v48 = vpop.f32.mrb[15].mxu0 }
 0x2b7   : > { %v2062_v20 = vadd.f32 %v4372_v32, %v2061_v48  ;;  %v2264_v30 = vpop.permute.xlu0 %2263 }
 0x2b8   : > { %v2165_v57 = vmax.f32 %v2067_v2, 0.0  ;;  %3253 = vmatprep.mubr.msk.f32.mxu1 %vm1828_vm9, %v2264_v30 }
 0x2b9   : > { %v2164_v23 = vmax.f32 %v2062_v20, 0.0 }
 0x2ba   : > { %2198 = vst.msk [vmem:[%s4385_s19 + $0x78] sm:$0xff] %vm2182_vm10, %v2165_v57 }
 0x2bb   : > { %2197 = vst.msk [vmem:[%s4385_s19 + $0x70] sm:$0xff] %vm2182_vm10, %v2164_v23 }
 0x2c0   : > { %v2266_v24 = vpop.permute.xlu1 %2265 }
 0x2c1   : > { %3254 = vmatmul.mubr.msk.f32.gmra.mrb[24].mxu1 %vm1828_vm9, %v2266_v24 }
 0x2c9   : > { %v3189_v25 = vpop.f32.mrb[16].mxu0 }
 0x2ca   : > { %v2077_v43 = vadd.f32 %v3189_v25, %v4372_v32  ;;  %v2071_v3 = vpop.f32.mrb[17].mxu0 }
 0x2cb   : > { %v2072_v9 = vadd.f32 %v4372_v32, %v2071_v3 }
 0x2cc   : > { %v2167_v36 = vmax.f32 %v2077_v43, 0.0 }
 0x2cd   : > { %v2166_v37 = vmax.f32 %v2072_v9, 0.0 }
 0x2ce   : > { %2200 = vst.msk [vmem:[%s4385_s19 + $0x88] sm:$0xff] %vm2182_vm10, %v2167_v36 }
 0x2cf   : > { %2199 = vst.msk [vmem:[%s4385_s19 + $0x80] sm:$0xff] %vm2182_vm10, %v2166_v37  ;;  %v2268_v0 = vpop.permute.xlu0 %2267 }
 0x2d0   : > { %3256 = vmatprep.mubr.msk.f32.mxu1 %vm1828_vm9, %v2268_v0 }
 0x2d8   : > { %v2270_v5 = vpop.permute.xlu1 %2269 }
 0x2d9   : > { %3257 = vmatmul.mubr.msk.f32.gmra.mrb[26].mxu1 %vm1828_vm9, %v2270_v5 }
 0x2dd   : > { %v3192_v41 = vpop.f32.mrb[18].mxu0 }
 0x2de   : > { %v2087_v8 = vadd.f32 %v3192_v41, %v4372_v32  ;;  %v2081_v46 = vpop.f32.mrb[19].mxu0 }
 0x2df   : > { %v2082_v61 = vadd.f32 %v4372_v32, %v2081_v46 }
 0x2e0   : > { %v2169_v34 = vmax.f32 %v2087_v8, 0.0 }
 0x2e1   : > { %v2168_v26 = vmax.f32 %v2082_v61, 0.0 }
 0x2e2   : > { %2202 = vst.msk [vmem:[%s4385_s19 + $0x98] sm:$0xff] %vm2182_vm10, %v2169_v34 }
 0x2e3   : > { %2201 = vst.msk [vmem:[%s4385_s19 + $0x90] sm:$0xff] %vm2182_vm10, %v2168_v26 }
 0x2e7   : > { %v2272_v1 = vpop.permute.xlu0 %2271 }
 0x2e8   : > { %3259 = vmatprep.mubr.msk.f32.mxu1 %vm1828_vm9, %v2272_v1 }
 0x2f0   : > { %v2274_v27 = vpop.permute.xlu1 %2273 }
 0x2f1   : > { %v3195_v11 = vpop.f32.mrb[20].mxu0  ;;  %3260 = vmatmul.mubr.msk.f32.gmra.mrb[28].mxu1 %vm1828_vm9, %v2274_v27 }
 0x2f2   : > { %v2097_v13 = vadd.f32 %v3195_v11, %v4372_v32  ;;  %v2091_v17 = vpop.f32.mrb[21].mxu0 }
 0x2f3   : > { %v2092_v10 = vadd.f32 %v4372_v32, %v2091_v17 }
 0x2f4   : > { %v2171_v38 = vmax.f32 %v2097_v13, 0.0 }
 0x2f5   : > { %v2170_v39 = vmax.f32 %v2092_v10, 0.0 }
 0x2f6   : > { %2204 = vst.msk [vmem:[%s4385_s19 + $0xa8] sm:$0xff] %vm2182_vm10, %v2171_v38 }
 0x2f7   : > { %2203 = vst.msk [vmem:[%s4385_s19 + $0xa0] sm:$0xff] %vm2182_vm10, %v2170_v39 }
 0x2fb   : > { %v2278_v19 = vpop.permute.xlu1 %2277 }
 0x2fc   : > { %v2276_v47 = vpop.permute.xlu0 %2275 }
 0x2fd   : > { %3262 = vmatprep.mubr.msk.f32.mxu1 %vm1828_vm9, %v2276_v47 }
 0x2fe   : > { %3263 = vmatmul.mubr.msk.f32.gmra.mrb[30].mxu1 %vm1828_vm9, %v2278_v19 }
 0x309   : > { %v3198_v28 = vpop.f32.mrb[22].mxu0 }
 0x30a   : > { %v2107_v31 = vadd.f32 %v3198_v28, %v4372_v32  ;;  %v2101_v15 = vpop.f32.mrb[23].mxu0 }
 0x30b   : > { %v2102_v53 = vadd.f32 %v4372_v32, %v2101_v15 }
 0x30c   : > { %v2173_v14 = vmax.f32 %v2107_v31, 0.0 }
 0x30d   : > { %v2172_v50 = vmax.f32 %v2102_v53, 0.0 }
 0x30e   : > { %2206 = vst.msk [vmem:[%s4385_s19 + $0xb8] sm:$0xff] %vm2182_vm10, %v2173_v14 }
 0x30f   : > { %2205 = vst.msk [vmem:[%s4385_s19 + $0xb0] sm:$0xff] %vm2182_vm10, %v2172_v50 }
 0x321   : > { %v3201_v49 = vpop.f32.mrb[24].mxu0 }
 0x322   : > { %v2117_v55 = vadd.f32 %v3201_v49, %v4372_v32  ;;  %v2111_v56 = vpop.f32.mrb[25].mxu0 }
 0x323   : > { %v2112_v40 = vadd.f32 %v4372_v32, %v2111_v56 }
 0x324   : > { %v2175_v33 = vmax.f32 %v2117_v55, 0.0 }
 0x325   : > { %v2174_v21 = vmax.f32 %v2112_v40, 0.0 }
 0x326   : > { %2208 = vst.msk [vmem:[%s4385_s19 + $0xc8] sm:$0xff] %vm2182_vm10, %v2175_v33 }
 0x327   : > { %2207 = vst.msk [vmem:[%s4385_s19 + $0xc0] sm:$0xff] %vm2182_vm10, %v2174_v21 }
 0x339   : > { %v3204_v12 = vpop.f32.mrb[26].mxu0 }
 0x33a   : > { %v2127_v16 = vadd.f32 %v3204_v12, %v4372_v32  ;;  %v2121_v52 = vpop.f32.mrb[27].mxu0 }
 0x33b   : > { %v2122_v4 = vadd.f32 %v4372_v32, %v2121_v52 }
 0x33c   : > { %v2177_v29 = vmax.f32 %v2127_v16, 0.0 }
 0x33d   : > { %v2176_v51 = vmax.f32 %v2122_v4, 0.0 }
 0x33e   : > { %2210 = vst.msk [vmem:[%s4385_s19 + $0xd8] sm:$0xff] %vm2182_vm10, %v2177_v29 }
 0x33f   : > { %2209 = vst.msk [vmem:[%s4385_s19 + $0xd0] sm:$0xff] %vm2182_vm10, %v2176_v51 }
 0x351   : > { %v3207_v18 = vpop.f32.mrb[28].mxu0 }
 0x352   : > { %v2137_v58 = vadd.f32 %v3207_v18, %v4372_v32  ;;  %v2131_v35 = vpop.f32.mrb[29].mxu0 }
 0x353   : > { %v2132_v44 = vadd.f32 %v4372_v32, %v2131_v35 }
 0x354   : > { %v2179_v45 = vmax.f32 %v2137_v58, 0.0 }
 0x355   : > { %v2178_v7 = vmax.f32 %v2132_v44, 0.0 }
 0x356   : > { %2212 = vst.msk [vmem:[%s4385_s19 + $0xe8] sm:$0xff] %vm2182_vm10, %v2179_v45 }
 0x357   : > { %2211 = vst.msk [vmem:[%s4385_s19 + $0xe0] sm:$0xff] %vm2182_vm10, %v2178_v7 }
 0x35a   : > { %v3219_v59 = vpop.f32.mrb[0].mxu1 }
 0x35b   : > { %v2415_v60 = vadd.f32 %v3219_v59, %v4372_v32  ;;  %v2409_v6 = vpop.f32.mrb[1].mxu1 }
 0x35c   : > { %v2410_v54 = vadd.f32 %v4372_v32, %v2409_v6 }
 0x35d   : > { %v2569_v22 = vmax.f32 %v2415_v60, 0.0 }
 0x35e   : > { %v2568_v42 = vmax.f32 %v2410_v54, 0.0  ;;  %v3210_v62 = vpop.f32.mrb[30].mxu0 }
 0x35f   : > { %v3222_v63 = vpop.f32.mrb[2].mxu1  ;;  %2634 = vrot.lane.b32.xlu1 %v2569_v22, %s3302_s21  ;;  %v2147_v2 = vadd.f32 %v3210_v62, %v4372_v32  ;;  %v2141_v20 = vpop.f32.mrb[31].mxu0 }
 0x360   : > { %v2425_v48 = vadd.f32 %v3222_v63, %v4372_v32  ;;  %v2419_v57 = vpop.f32.mrb[3].mxu1  ;;  %2632 = vrot.lane.b32.xlu0 %v2568_v42, %s3302_s21  ;;  %v2142_v30 = vadd.f32 %v4372_v32, %v2141_v20 }
 0x361   : > { %v2420_v23 = vadd.f32 %v4372_v32, %v2419_v57  ;;  %v2181_v24 = vmax.f32 %v2147_v2, 0.0 }
 0x362   : > { %v2571_v25 = vmax.f32 %v2425_v48, 0.0  ;;  %v2180_v43 = vmax.f32 %v2142_v30, 0.0 }
 0x363   : > { %v2570_v3 = vmax.f32 %v2420_v23, 0.0  ;;  %v3225_v9 = vpop.f32.mrb[4].mxu1  ;;  %2214 = vst.msk [vmem:[%s4385_s19 + $0xf8] sm:$0xff] %vm2182_vm10, %v2181_v24 }
 0x364   : > { %v2435_v36 = vadd.f32 %v3225_v9, %v4372_v32  ;;  %2638 = vrot.lane.b32.xlu1 %v2571_v25, %s3302_s21  ;;  %v2429_v37 = vpop.f32.mrb[5].mxu1  ;;  %2213 = vst.msk [vmem:[%s4385_s19 + $0xf0] sm:$0xff] %vm2182_vm10, %v2180_v43 }
 0x365   : > { %v2430_v0 = vadd.f32 %v4372_v32, %v2429_v37  ;;  %2636 = vrot.lane.b32.xlu0 %v2570_v3, %s3302_s21 }
 0x366   : > { %v2573_v5 = vmax.f32 %v2435_v36, 0.0 }
 0x367   : > { %v2572_v41 = vmax.f32 %v2430_v0, 0.0  ;;  %v3228_v8 = vpop.f32.mrb[6].mxu1 }
 0x368   : > { %v2445_v46 = vadd.f32 %v3228_v8, %v4372_v32  ;;  %2642 = vrot.lane.b32.xlu1 %v2573_v5, %s3302_s21  ;;  %v2439_v61 = vpop.f32.mrb[7].mxu1 }
 0x369   : > { %v2440_v34 = vadd.f32 %v4372_v32, %v2439_v61  ;;  %2640 = vrot.lane.b32.xlu0 %v2572_v41, %s3302_s21 }
 0x36a   : > { %v2575_v26 = vmax.f32 %v2445_v46, 0.0 }
 0x36b   : > { %v2574_v1 = vmax.f32 %v2440_v34, 0.0  ;;  %v3231_v27 = vpop.f32.mrb[8].mxu1 }
 0x36c   : > { %v2455_v11 = vadd.f32 %v3231_v27, %v4372_v32  ;;  %2646 = vrot.lane.b32.xlu1 %v2575_v26, %s3302_s21  ;;  %v2449_v13 = vpop.f32.mrb[9].mxu1 }
 0x36d   : > { %v2450_v17 = vadd.f32 %v4372_v32, %v2449_v13  ;;  %2644 = vrot.lane.b32.xlu0 %v2574_v1, %s3302_s21 }
 0x36e   : > { %v2577_v10 = vmax.f32 %v2455_v11, 0.0 }
 0x36f   : > { %v2576_v38 = vmax.f32 %v2450_v17, 0.0  ;;  %v3234_v39 = vpop.f32.mrb[10].mxu1 }
 0x370   : > { %v2465_v47 = vadd.f32 %v3234_v39, %v4372_v32  ;;  %2650 = vrot.lane.b32.xlu1 %v2577_v10, %s3302_s21  ;;  %v2459_v19 = vpop.f32.mrb[11].mxu1 }
 0x371   : > { %v2460_v28 = vadd.f32 %v4372_v32, %v2459_v19  ;;  %2648 = vrot.lane.b32.xlu0 %v2576_v38, %s3302_s21 }
 0x372   : > { %v2579_v31 = vmax.f32 %v2465_v47, 0.0 }
 0x373   : > { %v2578_v15 = vmax.f32 %v2460_v28, 0.0  ;;  %v3237_v53 = vpop.f32.mrb[12].mxu1 }
 0x374   : > { %v2475_v14 = vadd.f32 %v3237_v53, %v4372_v32  ;;  %2654 = vrot.lane.b32.xlu1 %v2579_v31, %s3302_s21  ;;  %v2469_v50 = vpop.f32.mrb[13].mxu1 }
 0x375   : > { %v2470_v49 = vadd.f32 %v4372_v32, %v2469_v50  ;;  %2652 = vrot.lane.b32.xlu0 %v2578_v15, %s3302_s21 }
 0x376   : > { %v2581_v55 = vmax.f32 %v2475_v14, 0.0 }
 0x377   : > { %v2580_v56 = vmax.f32 %v2470_v49, 0.0  ;;  %v3240_v40 = vpop.f32.mrb[14].mxu1 }
 0x378   : > { %v2485_v33 = vadd.f32 %v3240_v40, %v4372_v32  ;;  %2658 = vrot.lane.b32.xlu1 %v2581_v55, %s3302_s21  ;;  %v2479_v21 = vpop.f32.mrb[15].mxu1 }
 0x379   : > { %v2480_v12 = vadd.f32 %v4372_v32, %v2479_v21  ;;  %2656 = vrot.lane.b32.xlu0 %v2580_v56, %s3302_s21 }
 0x37a   : > { %v2583_v16 = vmax.f32 %v2485_v33, 0.0 }
 0x37b   : > { %v2582_v52 = vmax.f32 %v2480_v12, 0.0  ;;  %v3243_v4 = vpop.f32.mrb[16].mxu1 }
 0x37c   : > { %v2495_v29 = vadd.f32 %v3243_v4, %v4372_v32  ;;  %2662 = vrot.lane.b32.xlu1 %v2583_v16, %s3302_s21  ;;  %v2489_v51 = vpop.f32.mrb[17].mxu1 }
 0x37d   : > { %v2490_v18 = vadd.f32 %v4372_v32, %v2489_v51  ;;  %2660 = vrot.lane.b32.xlu0 %v2582_v52, %s3302_s21 }
 0x37e   : > { %v2585_v58 = vmax.f32 %v2495_v29, 0.0 }
 0x37f   : > { %v2584_v35 = vmax.f32 %v2490_v18, 0.0  ;;  %v3246_v44 = vpop.f32.mrb[18].mxu1 }
 0x380   : > { %v2505_v45 = vadd.f32 %v3246_v44, %v4372_v32  ;;  %2666 = vrot.lane.b32.xlu1 %v2585_v58, %s3302_s21  ;;  %v2499_v7 = vpop.f32.mrb[19].mxu1 }
 0x381   : > { %v2500_v59 = vadd.f32 %v4372_v32, %v2499_v7  ;;  %2664 = vrot.lane.b32.xlu0 %v2584_v35, %s3302_s21 }
 0x382   : > { %v2587_v60 = vmax.f32 %v2505_v45, 0.0 }
 0x383   : > { %v2586_v6 = vmax.f32 %v2500_v59, 0.0  ;;  %v3249_v54 = vpop.f32.mrb[20].mxu1 }
 0x384   : > { %v2515_v22 = vadd.f32 %v3249_v54, %v4372_v32  ;;  %2670 = vrot.lane.b32.xlu1 %v2587_v60, %s3302_s21  ;;  %v2509_v42 = vpop.f32.mrb[21].mxu1 }
 0x385   : > { %v2510_v62 = vadd.f32 %v4372_v32, %v2509_v42  ;;  %2668 = vrot.lane.b32.xlu0 %v2586_v6, %s3302_s21 }
 0x386   : > { %v2589_v63 = vmax.f32 %v2515_v22, 0.0 }
 0x387   : > { %v2588_v2 = vmax.f32 %v2510_v62, 0.0  ;;  %v3252_v48 = vpop.f32.mrb[22].mxu1 }
 0x388   : > { %v2525_v20 = vadd.f32 %v3252_v48, %v4372_v32  ;;  %2674 = vrot.lane.b32.xlu1 %v2589_v63, %s3302_s21  ;;  %v2519_v57 = vpop.f32.mrb[23].mxu1 }
 0x389   : > { %v2520_v30 = vadd.f32 %v4372_v32, %v2519_v57  ;;  %2672 = vrot.lane.b32.xlu0 %v2588_v2, %s3302_s21 }
 0x38a   : > { %v2591_v23 = vmax.f32 %v2525_v20, 0.0 }
 0x38b   : > { %v2590_v24 = vmax.f32 %v2520_v30, 0.0 }
 0x38c   : > { %2678 = vrot.lane.b32.xlu1 %v2591_v23, %s3302_s21 }
 0x38d   : > { %2676 = vrot.lane.b32.xlu0 %v2590_v24, %s3302_s21 }
 0x394   : > { %v3255_v25 = vpop.f32.mrb[24].mxu1 }
 0x395   : > { %v2535_v43 = vadd.f32 %v3255_v25, %v4372_v32  ;;  %v2529_v3 = vpop.f32.mrb[25].mxu1 }
 0x396   : > { %v2530_v9 = vadd.f32 %v4372_v32, %v2529_v3 }
 0x397   : > { %v2593_v36 = vmax.f32 %v2535_v43, 0.0 }
 0x398   : > { %v2592_v37 = vmax.f32 %v2530_v9, 0.0 }
 0x399   : > { %2682 = vrot.lane.b32.xlu1 %v2593_v36, %s3302_s21 }
 0x39a   : > { %2680 = vrot.lane.b32.xlu0 %v2592_v37, %s3302_s21 }
 0x3ac   : > { %v3258_v0 = vpop.f32.mrb[26].mxu1 }
 0x3ad   : > { %v2545_v5 = vadd.f32 %v3258_v0, %v4372_v32  ;;  %v2539_v41 = vpop.f32.mrb[27].mxu1 }
 0x3ae   : > { %v2540_v8 = vadd.f32 %v4372_v32, %v2539_v41 }
 0x3af   : > { %v2595_v46 = vmax.f32 %v2545_v5, 0.0 }
 0x3b0   : > { %v2594_v61 = vmax.f32 %v2540_v8, 0.0 }
 0x3b1   : > { %2686 = vrot.lane.b32.xlu1 %v2595_v46, %s3302_s21 }
 0x3b2   : > { %2684 = vrot.lane.b32.xlu0 %v2594_v61, %s3302_s21 }
 0x3c4   : > { %v3261_v34 = vpop.f32.mrb[28].mxu1 }
 0x3c5   : > { %v2555_v26 = vadd.f32 %v3261_v34, %v4372_v32  ;;  %v2549_v1 = vpop.f32.mrb[29].mxu1 }
 0x3c6   : > { %v2550_v27 = vadd.f32 %v4372_v32, %v2549_v1 }
 0x3c7   : > { %v2597_v11 = vmax.f32 %v2555_v26, 0.0 }
 0x3c8   : > { %v2596_v13 = vmax.f32 %v2550_v27, 0.0 }
 0x3c9   : > { %2690 = vrot.lane.b32.xlu1 %v2597_v11, %s3302_s21 }
 0x3ca   : > { %2688 = vrot.lane.b32.xlu0 %v2596_v13, %s3302_s21 }
 0x3d1   : > { %v2635_v17 = vpop.permute.xlu1 %2634  ;;  %v3264_v10 = vpop.f32.mrb[30].mxu1 }
 0x3d2   : > { %2730 = vst.msk [vmem:[%s4385_s19 + $0x8] sm:$0xff] %vm2728_vm11, %v2635_v17  ;;  %v2565_v38 = vadd.f32 %v3264_v10, %v4372_v32  ;;  %v2559_v39 = vpop.f32.mrb[31].mxu1  ;;  %v2633_v47 = vpop.permute.xlu0 %2632 }
 0x3d3   : > { %v2560_v19 = vadd.f32 %v4372_v32, %v2559_v39  ;;  %2729 = vst.msk [vmem:[%s4385_s19] sm:$0xff] %vm2728_vm11, %v2633_v47 }
 0x3d4   : > { %v2599_v28 = vmax.f32 %v2565_v38, 0.0 }
 0x3d5   : > { %v2598_v31 = vmax.f32 %v2560_v19, 0.0 }
 0x3d6   : > { %v2639_v15 = vpop.permute.xlu1 %2638  ;;  %2694 = vrot.lane.b32.xlu1 %v2599_v28, %s3302_s21 }
 0x3d7   : > { %2732 = vst.msk [vmem:[%s4385_s19 + $0x18] sm:$0xff] %vm2728_vm11, %v2639_v15  ;;  %v2637_v53 = vpop.permute.xlu0 %2636  ;;  %2692 = vrot.lane.b32.xlu0 %v2598_v31, %s3302_s21 }
 0x3d8   : > { %2731 = vst.msk [vmem:[%s4385_s19 + $0x10] sm:$0xff] %vm2728_vm11, %v2637_v53 }
 0x3da   : > { %v2643_v32 = vpop.permute.xlu1 %2642 }
 0x3db   : > { %2734 = vst.msk [vmem:[%s4385_s19 + $0x28] sm:$0xff] %vm2728_vm11, %v2643_v32  ;;  %v2641_v14 = vpop.permute.xlu0 %2640 }
 0x3dc   : > { %2733 = vst.msk [vmem:[%s4385_s19 + $0x20] sm:$0xff] %vm2728_vm11, %v2641_v14 }
 0x3de   : > { %v2647_v50 = vpop.permute.xlu1 %2646 }
 0x3df   : > { %2736 = vst.msk [vmem:[%s4385_s19 + $0x38] sm:$0xff] %vm2728_vm11, %v2647_v50  ;;  %v2645_v49 = vpop.permute.xlu0 %2644 }
 0x3e0   : > { %2735 = vst.msk [vmem:[%s4385_s19 + $0x30] sm:$0xff] %vm2728_vm11, %v2645_v49 }
 0x3e2   : > { %v2651_v55 = vpop.permute.xlu1 %2650 }
 0x3e3   : > { %2738 = vst.msk [vmem:[%s4385_s19 + $0x48] sm:$0xff] %vm2728_vm11, %v2651_v55  ;;  %v2649_v56 = vpop.permute.xlu0 %2648 }
 0x3e4   : > { %2737 = vst.msk [vmem:[%s4385_s19 + $0x40] sm:$0xff] %vm2728_vm11, %v2649_v56 }
 0x3e6   : > { %v2655_v40 = vpop.permute.xlu1 %2654 }
 0x3e7   : > { %2740 = vst.msk [vmem:[%s4385_s19 + $0x58] sm:$0xff] %vm2728_vm11, %v2655_v40  ;;  %v2653_v33 = vpop.permute.xlu0 %2652 }
 0x3e8   : > { %2739 = vst.msk [vmem:[%s4385_s19 + $0x50] sm:$0xff] %vm2728_vm11, %v2653_v33 }
 0x3ea   : > { %v2659_v21 = vpop.permute.xlu1 %2658 }
 0x3eb   : > { %2742 = vst.msk [vmem:[%s4385_s19 + $0x68] sm:$0xff] %vm2728_vm11, %v2659_v21  ;;  %v2657_v12 = vpop.permute.xlu0 %2656 }
 0x3ec   : > { %2741 = vst.msk [vmem:[%s4385_s19 + $0x60] sm:$0xff] %vm2728_vm11, %v2657_v12 }
 0x3ee   : > { %v2663_v16 = vpop.permute.xlu1 %2662 }
 0x3ef   : > { %2744 = vst.msk [vmem:[%s4385_s19 + $0x78] sm:$0xff] %vm2728_vm11, %v2663_v16  ;;  %v2661_v52 = vpop.permute.xlu0 %2660 }
 0x3f0   : > { %2743 = vst.msk [vmem:[%s4385_s19 + $0x70] sm:$0xff] %vm2728_vm11, %v2661_v52 }
 0x3f2   : > { %v2667_v4 = vpop.permute.xlu1 %2666 }
 0x3f3   : > { %2746 = vst.msk [vmem:[%s4385_s19 + $0x88] sm:$0xff] %vm2728_vm11, %v2667_v4  ;;  %v2665_v29 = vpop.permute.xlu0 %2664 }
 0x3f4   : > { %2745 = vst.msk [vmem:[%s4385_s19 + $0x80] sm:$0xff] %vm2728_vm11, %v2665_v29 }
 0x3f6   : > { %v2671_v51 = vpop.permute.xlu1 %2670 }
 0x3f7   : > { %2748 = vst.msk [vmem:[%s4385_s19 + $0x98] sm:$0xff] %vm2728_vm11, %v2671_v51  ;;  %v2669_v18 = vpop.permute.xlu0 %2668 }
 0x3f8   : > { %2747 = vst.msk [vmem:[%s4385_s19 + $0x90] sm:$0xff] %vm2728_vm11, %v2669_v18 }
 0x3fa   : > { %v2675_v58 = vpop.permute.xlu1 %2674 }
 0x3fb   : > { %2750 = vst.msk [vmem:[%s4385_s19 + $0xa8] sm:$0xff] %vm2728_vm11, %v2675_v58  ;;  %v2673_v35 = vpop.permute.xlu0 %2672 }
 0x3fc   : > { %2749 = vst.msk [vmem:[%s4385_s19 + $0xa0] sm:$0xff] %vm2728_vm11, %v2673_v35 }
 0x3fe   : > { %v2679_v44 = vpop.permute.xlu1 %2678 }
 0x3ff   : > { %2752 = vst.msk [vmem:[%s4385_s19 + $0xb8] sm:$0xff] %vm2728_vm11, %v2679_v44  ;;  %v2677_v45 = vpop.permute.xlu0 %2676 }
 0x400   : > { %2751 = vst.msk [vmem:[%s4385_s19 + $0xb0] sm:$0xff] %vm2728_vm11, %v2677_v45 }
 0x40b   : > { %v2683_v7 = vpop.permute.xlu1 %2682 }
 0x40c   : > { %2754 = vst.msk [vmem:[%s4385_s19 + $0xc8] sm:$0xff] %vm2728_vm11, %v2683_v7  ;;  %v2681_v59 = vpop.permute.xlu0 %2680 }
 0x40d   : > { %2753 = vst.msk [vmem:[%s4385_s19 + $0xc0] sm:$0xff] %vm2728_vm11, %v2681_v59 }
 0x423   : > { %v2687_v60 = vpop.permute.xlu1 %2686 }
 0x424   : > { %2756 = vst.msk [vmem:[%s4385_s19 + $0xd8] sm:$0xff] %vm2728_vm11, %v2687_v60  ;;  %v2685_v6 = vpop.permute.xlu0 %2684 }
 0x425   : > { %2755 = vst.msk [vmem:[%s4385_s19 + $0xd0] sm:$0xff] %vm2728_vm11, %v2685_v6 }
 0x43b   : > { %v2691_v54 = vpop.permute.xlu1 %2690 }
 0x43c   : > { %2758 = vst.msk [vmem:[%s4385_s19 + $0xe8] sm:$0xff] %vm2728_vm11, %v2691_v54  ;;  %v2689_v22 = vpop.permute.xlu0 %2688 }
 0x43d   : > { %2757 = vst.msk [vmem:[%s4385_s19 + $0xe0] sm:$0xff] %vm2728_vm11, %v2689_v22 }
 0x448   : > { %v2695_v42 = vpop.permute.xlu1 %2694 }
 0x449   : > { %2760 = vst.msk [vmem:[%s4385_s19 + $0xf8] sm:$0xff] %vm2728_vm11, %v2695_v42  ;;  %v2693_v62 = vpop.permute.xlu0 %2692 }
 0x44a   : > { %2759 = vst.msk [vmem:[%s4385_s19 + $0xf0] sm:$0xff] %vm2728_vm11, %v2693_v62 }
 0x44b PF: > { %s13_s12 = sadd.s32 1, %s3297_s12  }
 0x44c   : > { %p10_p4 = scmp.ge.s32.totalorder %s13_s12, 4  }
 0x44e   :  { %12 = sbr.rel (!%p10_p4) target bundleno = 1 (0x1), region = 65 }

</bundles_post_ra>
